<compile_context>
chip_gen: v5e
topology: v5e:2x2
jax: 0.10.0
libtpu: 0.0.40
codegen_flags: <defaults>
</compile_context>

<pallas_src>
import math
import functools

import jax
import jax.numpy as jnp
from jax.experimental import pallas as pl
from jax.experimental.pallas import tpu as pltpu


def _layer_norm_f32(x, gamma, beta, eps):
    mu = jnp.mean(x, axis=-1, keepdims=True)
    var = jnp.mean((x - mu) ** 2, axis=-1, keepdims=True)
    return (x - mu) * jax.lax.rsqrt(var + eps) * gamma + beta


def fused_encoder_kernel(x_ref, wqkv_ref, bqkv_ref, wo_ref, bo_ref,
                         w1_ref, b1_ref, w2_ref, b2_ref,
                         g1_ref, be1_ref, g2_ref, be2_ref, o_ref,
                         *, num_heads, head_dim, batch_tile, seq_len, eps=1e-5):
    l = pl.program_id(1)

    # Layer 0: load the input activation into the VMEM-resident output block (the accumulator).
    @pl.when(l == 0)
    def _():
        o_ref[...] = x_ref[...]

    bt, S, H, hd = batch_tile, seq_len, num_heads, head_dim
    D = H * hd
    R = bt * S
    G = bt * H

    x = o_ref[...].reshape(R, D)               # (R, D) f32, resident across the layer axis
    x_b16 = x.astype(jnp.bfloat16)

    # ---------------- fused QKV projection: one (R, D) @ (D, 3D) full-width matmul ----------------
    # Columns are grouped [Q | K | V] (head-major within each group); 1/sqrt(hd) folded into Q.
    qkv = jnp.dot(x_b16, wqkv_ref[0], preferred_element_type=jnp.float32) + bqkv_ref[0]
    qkv = qkv.astype(jnp.bfloat16)             # cast once; logits/softmax stay f32

    def heads(t):                              # (R, D) -> (bt*H, S, hd), head-batched layout
        return jnp.transpose(t.reshape(bt, S, H, hd), (0, 2, 1, 3)).reshape(G, S, hd)

    q = heads(qkv[:, :D])                      # pre-scaled
    k = heads(qkv[:, D:2 * D])
    v = heads(qkv[:, 2 * D:])

    # ---------------- attention core (batch * heads batched; no Python loop / concat) -------------
    # TODO(synk): mask path; flash-style KV tiling for long sequences.
    logits = jnp.einsum('gqe,gke->gqk', q, k, preferred_element_type=jnp.float32)
    logits = logits - jnp.max(logits, axis=-1, keepdims=True)
    p = jnp.exp(logits)                        # f32 softmax
    attn = p * pl.reciprocal(jnp.sum(p, axis=-1, keepdims=True), approx=True)
    vals = jnp.einsum('gqk,gke->gqe', attn.astype(jnp.bfloat16), v,
                      preferred_element_type=jnp.float32)        # (G, S, hd)

    # Concat-heads relayout (G,S,hd) -> (R, D), then one full-width output projection (K = D).
    vals = jnp.transpose(vals.reshape(bt, H, S, hd), (0, 2, 1, 3)).reshape(R, D)
    attn_out = jnp.dot(vals.astype(jnp.bfloat16), wo_ref[0],
                       preferred_element_type=jnp.float32) + bo_ref[0]

    # ---------------- residual + LayerNorm 1 (f32) ----------------
    x = _layer_norm_f32(x + attn_out, g1_ref[0], be1_ref[0], eps)

    # ---------------- FFN on the whole (R, D) row slab ----------------
    # TODO(synk): tile over the FF dimension for v7x-sized configs.
    h1 = jnp.dot(x.astype(jnp.bfloat16), w1_ref[0],
                 preferred_element_type=jnp.float32) + b1_ref[0]
    h1 = jnp.maximum(h1, 0.0)
    ff = jnp.dot(h1.astype(jnp.bfloat16), w2_ref[0],
                 preferred_element_type=jnp.float32) + b2_ref[0]

    # ---------------- residual + LayerNorm 2 (f32) ----------------
    x = _layer_norm_f32(x + ff, g2_ref[0], be2_ref[0], eps)

    o_ref[...] = x.reshape(bt, S, D)


def _vmem_limit_bytes(bt, S, D, FF, H):
    """Budget computed from actual block sizes, capped at ~80% of physical VMEM."""
    R = bt * S
    # Per-layer weight block: wqkv (D,3D) + wo (D,D) + w1/w2 (D,FF) in bf16, f32 biases/LN params.
    weight_block = 2 * (3 * D * D + D * D + 2 * D * FF) + 4 * (8 * D + FF)
    act_blocks = 3 * 4 * R * D                          # x input (double-buffered) + resident out
    # In-kernel intermediates (upper bound): qkv (f32+bf16), q/k/v, logits/softmax, vals, FFN hidden.
    interm = 6 * R * 3 * D + 6 * R * D + 8 * bt * H * S * S + 6 * R * FF + 8 * R * D
    need = 2 * weight_block + act_blocks + interm
    try:
        phys = pltpu.get_tpu_info().vmem_capacity_bytes
    except Exception:
        phys = 64 * 1024 * 1024                         # conservative fallback (v7x per-core VMEM)
    return int(min(max(2 * need, 32 * 1024 * 1024), int(phys * 0.8)))


def transformer_encoder(x, stacked_params, num_heads, *, batch_tile=None, eps=1e-5):
    """Full TransformerEncoder forward in a single fused pallas_call."""
    (wqkv, bqkv, wo, bo, w1, b1, w2, b2, g1, be1, g2, be2) = stacked_params
    B, S, D = x.shape
    L = wqkv.shape[0]
    FF = w1.shape[-1]
    hd = D // num_heads
    if batch_tile is None:
        batch_tile = B    # single-TC v5e/v6e: one batch tile => weights streamed once per layer.
                          # On v7x pass batch_tile=B//2 so the "parallel" axis covers both TCs.
    assert B % batch_tile == 0
    nb = B // batch_tile

    kern = functools.partial(fused_encoder_kernel, num_heads=num_heads, head_dim=hd,
                             batch_tile=batch_tile, seq_len=S, eps=eps)

    act_spec = pl.BlockSpec((batch_tile, S, D), lambda b, l: (b, 0, 0))

    def wspec(shape):
        nd = len(shape)
        return pl.BlockSpec((1,) + tuple(shape[1:]),
                            lambda b, l, _nd=nd: (l,) + (0,) * (_nd - 1))

    in_specs = [act_spec,
                wspec(wqkv.shape), wspec(bqkv.shape),
                wspec(wo.shape), wspec(bo.shape),
                wspec(w1.shape), wspec(b1.shape), wspec(w2.shape), wspec(b2.shape),
                wspec(g1.shape), wspec(be1.shape), wspec(g2.shape), wspec(be2.shape)]

    return pl.pallas_call(
        kern,
        out_shape=jax.ShapeDtypeStruct((B, S, D), jnp.float32),
        grid=(nb, L),
        in_specs=in_specs,
        out_specs=act_spec,
        compiler_params=pltpu.CompilerParams(
            dimension_semantics=("parallel", "arbitrary"),
            vmem_limit_bytes=_vmem_limit_bytes(batch_tile, S, D, FF, num_heads)),
    )(x, wqkv, bqkv, wo, bo, w1, b1, w2, b2, g1, be1, g2, be2)


# ---------------- deterministic parameter init (PyTorch layout) ----------------
def _xavier(key, fan_in, fan_out):
    limit = math.sqrt(6.0 / (fan_in + fan_out))
    return jax.random.uniform(key, (fan_in, fan_out), jnp.float32, -limit, limit)


def init_params(key, num_layers, input_dim, dim_feedforward):
    layers = []
    for l in range(num_layers):
        k0, k1, k2, k3 = jax.random.split(jax.random.fold_in(key, l), 4)
        wqkv = _xavier(k0, input_dim, 3 * input_dim)     # columns grouped per head [q|k|v] (PyTorch)
        bqkv = jnp.zeros((1, 3 * input_dim), jnp.float32)
        wo = _xavier(k1, input_dim, input_dim)
        bo = jnp.zeros((1, input_dim), jnp.float32)
        w1 = _xavier(k2, input_dim, dim_feedforward)
        b1 = jnp.zeros((1, dim_feedforward), jnp.float32)
        w2 = _xavier(k3, dim_feedforward, input_dim)
        b2 = jnp.zeros((1, input_dim), jnp.float32)
        g1 = jnp.ones((1, input_dim), jnp.float32)
        be1 = jnp.zeros((1, input_dim), jnp.float32)
        g2 = jnp.ones((1, input_dim), jnp.float32)
        be2 = jnp.zeros((1, input_dim), jnp.float32)
        layers.append((wqkv, bqkv, wo, bo, w1, b1, w2, b2, g1, be1, g2, be2))
    return layers


def prepare_params(layer_params, num_heads):
    """Host-side: regroup QKV columns from PyTorch per-head [q|k|v] interleave to [Q | K | V]
    (head-major), fold 1/sqrt(head_dim) into the Q columns, stack across layers, cast matmul
    weights to bf16 (biases / LN params stay f32)."""
    wqkv_l, bqkv_l = [], []
    wo_l, bo_l, w1_l, b1_l, w2_l, b2_l = [], [], [], [], [], []
    g1_l, be1_l, g2_l, be2_l = [], [], [], []
    for (wqkv, bqkv, wo, bo, w1, b1, w2, b2, g1, be1, g2, be2) in layer_params:
        D = wqkv.shape[0]
        hd = D // num_heads
        scale = 1.0 / math.sqrt(hd)
        w3 = wqkv.reshape(D, num_heads, 3, hd)      # column index = h*3*hd + j*hd + e
        b3 = bqkv.reshape(num_heads, 3, hd)
        wq = w3[:, :, 0, :].reshape(D, D) * scale   # scale folded into Q
        wk = w3[:, :, 1, :].reshape(D, D)
        wv = w3[:, :, 2, :].reshape(D, D)
        bq = b3[:, 0, :].reshape(1, D) * scale
        bk = b3[:, 1, :].reshape(1, D)
        bv = b3[:, 2, :].reshape(1, D)
        wqkv_l.append(jnp.concatenate([wq, wk, wv], axis=1))    # (D, 3D), groups [Q|K|V]
        bqkv_l.append(jnp.concatenate([bq, bk, bv], axis=1))    # (1, 3D)
        wo_l.append(wo); bo_l.append(bo)
        w1_l.append(w1); b1_l.append(b1); w2_l.append(w2); b2_l.append(b2)
        g1_l.append(g1); be1_l.append(be1); g2_l.append(g2); be2_l.append(be2)
    st = lambda xs: jnp.stack(xs, axis=0)
    bf = lambda a: a.astype(jnp.bfloat16)
    return (bf(st(wqkv_l)), st(bqkv_l),
            bf(st(wo_l)), st(bo_l),
            bf(st(w1_l)), st(b1_l), bf(st(w2_l)), st(b2_l),
            st(g1_l), st(be1_l), st(g2_l), st(be2_l))


# ---------------- pure-JAX reference (same bf16-matmul / f32-accumulate policy) ----------------
def _mm(a, b):
    return jnp.dot(a.astype(jnp.bfloat16), b.astype(jnp.bfloat16),
                   preferred_element_type=jnp.float32)


def _ref_block(x, params, num_heads, eps=1e-5):
    (wqkv, bqkv, wo, bo, w1, b1, w2, b2, g1, be1, g2, be2) = params
    B, S, D = x.shape
    hd = D // num_heads
    qkv = _mm(x.reshape(B * S, D), wqkv).reshape(B, S, 3 * D) + bqkv
    qkv = qkv.reshape(B, S, num_heads, 3 * hd).transpose(0, 2, 1, 3)
    q, k, v = qkv[..., :hd], qkv[..., hd:2 * hd], qkv[..., 2 * hd:]
    q = q / math.sqrt(hd)
    logits = jnp.einsum('bhqd,bhkd->bhqk', q.astype(jnp.bfloat16), k.astype(jnp.bfloat16),
                        preferred_element_type=jnp.float32)
    attn = jax.nn.softmax(logits, axis=-1)
    vals = jnp.einsum('bhqk,bhkd->bhqd', attn.astype(jnp.bfloat16), v.astype(jnp.bfloat16),
                      preferred_element_type=jnp.float32)
    vals = vals.transpose(0, 2, 1, 3).reshape(B, S, D)
    o = _mm(vals.reshape(B * S, D), wo).reshape(B, S, D) + bo
    x = x + o
    mu = x.mean(-1, keepdims=True); var = ((x - mu) ** 2).mean(-1, keepdims=True)
    x = (x - mu) / jnp.sqrt(var + eps) * g1 + be1
    h1 = jnp.maximum(_mm(x.reshape(B * S, D), w1) + b1, 0.0)
    ff = (_mm(h1, w2) + b2).reshape(B, S, D)
    x = x + ff
    mu = x.mean(-1, keepdims=True); var = ((x - mu) ** 2).mean(-1, keepdims=True)
    x = (x - mu) / jnp.sqrt(var + eps) * g2 + be2
    return x


if __name__ == "__main__":
    B, S, D = 2, 8, 32
    NUM_HEADS = 4
    DIM_FF = 64
    NUM_LAYERS = 2

    key = jax.random.PRNGKey(0)
    kx, kp = jax.random.split(key)
    x = jax.random.normal(kx, (B, S, D), jnp.float32)
    layer_params = init_params(kp, NUM_LAYERS, D, DIM_FF)
    stacked = prepare_params(layer_params, NUM_HEADS)

    out = transformer_encoder(x, stacked, NUM_HEADS)
    out = jax.block_until_ready(out)

    ref = x
    for p in layer_params:
        ref = _ref_block(ref, p, NUM_HEADS)

    assert out.shape == (B, S, D)
    err = float(jnp.abs(out - ref).max())
    assert jnp.allclose(out, ref, atol=1e-2, rtol=1e-2), err
    print("KERNEL_OK")
</pallas_src>

<mosaic_0001>
module attributes {stable_mosaic.version = 11 : i64} {
  func.func @fused_encoder_kernel(%arg0: i32, %arg1: i32, %arg2: memref<2x8x32xf32, #tpu.memory_space<vmem>>, %arg3: memref<1x32x96xbf16, #tpu.memory_space<vmem>>, %arg4: memref<1x1x96xf32, #tpu.memory_space<vmem>>, %arg5: memref<1x32x32xbf16, #tpu.memory_space<vmem>>, %arg6: memref<1x1x32xf32, #tpu.memory_space<vmem>>, %arg7: memref<1x32x64xbf16, #tpu.memory_space<vmem>>, %arg8: memref<1x1x64xf32, #tpu.memory_space<vmem>>, %arg9: memref<1x64x32xbf16, #tpu.memory_space<vmem>>, %arg10: memref<1x1x32xf32, #tpu.memory_space<vmem>>, %arg11: memref<1x1x32xf32, #tpu.memory_space<vmem>>, %arg12: memref<1x1x32xf32, #tpu.memory_space<vmem>>, %arg13: memref<1x1x32xf32, #tpu.memory_space<vmem>>, %arg14: memref<1x1x32xf32, #tpu.memory_space<vmem>>, %arg15: memref<2x8x32xf32, #tpu.memory_space<vmem>>) attributes {dimension_semantics = [#tpu.dimension_semantics<parallel>, #tpu.dimension_semantics<arbitrary>], iteration_bounds = array<i64: 1, 2>, scalar_prefetch = 0 : i64, scratch_operands = 0 : i64, tpu.core_type = #tpu.core_type<tc>, window_params = [{transform_indices = @transform_0, window_bounds = array<i64: 2, 8, 32>}, {transform_indices = @transform_1, window_bounds = array<i64: 1, 32, 96>}, {transform_indices = @transform_2, window_bounds = array<i64: 1, 1, 96>}, {transform_indices = @transform_3, window_bounds = array<i64: 1, 32, 32>}, {transform_indices = @transform_4, window_bounds = array<i64: 1, 1, 32>}, {transform_indices = @transform_5, window_bounds = array<i64: 1, 32, 64>}, {transform_indices = @transform_6, window_bounds = array<i64: 1, 1, 64>}, {transform_indices = @transform_7, window_bounds = array<i64: 1, 64, 32>}, {transform_indices = @transform_8, window_bounds = array<i64: 1, 1, 32>}, {transform_indices = @transform_9, window_bounds = array<i64: 1, 1, 32>}, {transform_indices = @transform_10, window_bounds = array<i64: 1, 1, 32>}, {transform_indices = @transform_11, window_bounds = array<i64: 1, 1, 32>}, {transform_indices = @transform_12, window_bounds = array<i64: 1, 1, 32>}, {transform_indices = @transform_13, window_bounds = array<i64: 2, 8, 32>}]} {
    %c0_i32 = arith.constant 0 : i32
    %0 = arith.cmpi eq, %arg1, %c0_i32 : i32
    %1 = arith.extui %0 : i1 to i32
    %c0_i32_0 = arith.constant 0 : i32
    %2 = arith.cmpi ne, %1, %c0_i32_0 : i32
    scf.if %2 {
      %c0_60 = arith.constant 0 : index
      %c0_61 = arith.constant 0 : index
      %c0_62 = arith.constant 0 : index
      %124 = vector.load %arg2[%c0_60, %c0_61, %c0_62] : memref<2x8x32xf32, #tpu.memory_space<vmem>>, vector<2x8x32xf32>
      %c0_63 = arith.constant 0 : index
      %c0_64 = arith.constant 0 : index
      %c0_65 = arith.constant 0 : index
      %125 = vector.load %arg15[%c0_63, %c0_64, %c0_65] : memref<2x8x32xf32, #tpu.memory_space<vmem>>, vector<2x8x32xf32>
      tpu.vector_store %arg15[%c0_63, %c0_64, %c0_65], %124 {strides = array<i32>} : memref<2x8x32xf32, #tpu.memory_space<vmem>>, vector<2x8x32xf32>,
    } else {
    }
    %c0 = arith.constant 0 : index
    %c0_1 = arith.constant 0 : index
    %c0_2 = arith.constant 0 : index
    %3 = vector.load %arg15[%c0, %c0_1, %c0_2] : memref<2x8x32xf32, #tpu.memory_space<vmem>>, vector<2x8x32xf32>
    %4 = vector.shape_cast %3 : vector<2x8x32xf32> to vector<16x32xf32>
    %5 = arith.truncf %4 : vector<16x32xf32> to vector<16x32xbf16>
    %c0_3 = arith.constant 0 : index
    %c0_4 = arith.constant 0 : index
    %c0_5 = arith.constant 0 : index
    %6 = vector.load %arg3[%c0_3, %c0_4, %c0_5] : memref<1x32x96xbf16, #tpu.memory_space<vmem>>, vector<1x32x96xbf16>
    %7 = vector.shape_cast %6 : vector<1x32x96xbf16> to vector<32x96xbf16>
    %cst = arith.constant dense<0.000000e+00> : vector<16x96xf32>
    %8 = tpu.matmul %5, %7, %cst {dimension_numbers = #tpu.dot_dimension_numbers<[1], [0], [0], [1], [0, 0, 1, 1], [], []>} : vector<16x32xbf16>, vector<32x96xbf16>, vector<16x96xf32> -> vector<16x96xf32>
    %c0_6 = arith.constant 0 : index
    %c0_7 = arith.constant 0 : index
    %c0_8 = arith.constant 0 : index
    %9 = vector.load %arg4[%c0_6, %c0_7, %c0_8] : memref<1x1x96xf32, #tpu.memory_space<vmem>>, vector<1x1x96xf32>
    %10 = vector.shape_cast %9 : vector<1x1x96xf32> to vector<1x96xf32>
    %11 = vector.broadcast %10 : vector<1x96xf32> to vector<16x96xf32>
    %12 = arith.addf %8, %11 : vector<16x96xf32>
    %13 = arith.truncf %12 : vector<16x96xf32> to vector<16x96xbf16>
    %14 = vector.extract_strided_slice %13 {offsets = [0, 0], sizes = [16, 32], strides = [1, 1]} : vector<16x96xbf16> to vector<16x32xbf16>
    %15 = vector.shape_cast %14 : vector<16x32xbf16> to vector<2x8x4x8xbf16>
    %16 = tpu.transpose %15, [0, 2, 1, 3] : vector<2x8x4x8xbf16> -> vector<2x4x8x8xbf16>
    %17 = vector.shape_cast %16 : vector<2x4x8x8xbf16> to vector<8x8x8xbf16>
    %18 = vector.extract_strided_slice %13 {offsets = [0, 32], sizes = [16, 32], strides = [1, 1]} : vector<16x96xbf16> to vector<16x32xbf16>
    %19 = vector.shape_cast %18 : vector<16x32xbf16> to vector<2x8x4x8xbf16>
    %20 = tpu.transpose %19, [0, 2, 1, 3] : vector<2x8x4x8xbf16> -> vector<2x4x8x8xbf16>
    %21 = vector.shape_cast %20 : vector<2x4x8x8xbf16> to vector<8x8x8xbf16>
    %22 = vector.extract_strided_slice %13 {offsets = [0, 64], sizes = [16, 32], strides = [1, 1]} : vector<16x96xbf16> to vector<16x32xbf16>
    %23 = vector.shape_cast %22 : vector<16x32xbf16> to vector<2x8x4x8xbf16>
    %24 = tpu.transpose %23, [0, 2, 1, 3] : vector<2x8x4x8xbf16> -> vector<2x4x8x8xbf16>
    %25 = vector.shape_cast %24 : vector<2x4x8x8xbf16> to vector<8x8x8xbf16>
    "tpu.trace_start"() <{level = 10 : i32, message = "gqe,gke->gqk"}> : () -> ()
    %cst_9 = arith.constant dense<0.000000e+00> : vector<8x8x8xf32>
    %26 = tpu.matmul %17, %21, %cst_9 {dimension_numbers = #tpu.dot_dimension_numbers<[2], [2], [1], [1], [0, 0, 0, 1, 1, 1], [0], [0]>} : vector<8x8x8xbf16>, vector<8x8x8xbf16>, vector<8x8x8xf32> -> vector<8x8x8xf32>
    "tpu.trace_stop"() : () -> ()
    %cst_10 = arith.constant dense<0xFF800000> : vector<8x8xf32>
    %27 = vector.multi_reduction <maximumf>, %26, %cst_10 [2] : vector<8x8x8xf32> to vector<8x8xf32>
    %28 = vector.shape_cast %27 : vector<8x8xf32> to vector<8x8x1xf32>
    %29 = vector.broadcast %28 : vector<8x8x1xf32> to vector<8x8x8xf32>
    %30 = arith.subf %26, %29 : vector<8x8x8xf32>
    %31 = math.exp %30 : vector<8x8x8xf32>
    %cst_11 = arith.constant dense<0.000000e+00> : vector<8x8xf32>
    %32 = vector.multi_reduction <add>, %31, %cst_11 [2] : vector<8x8x8xf32> to vector<8x8xf32>
    %33 = vector.shape_cast %32 : vector<8x8xf32> to vector<8x8x1xf32>
    %34 = tpu.reciprocal %33 {approx = true} : vector<8x8x1xf32> -> vector<8x8x1xf32>
    %35 = vector.broadcast %34 : vector<8x8x1xf32> to vector<8x8x8xf32>
    %36 = arith.mulf %31, %35 : vector<8x8x8xf32>
    %37 = arith.truncf %36 : vector<8x8x8xf32> to vector<8x8x8xbf16>
    "tpu.trace_start"() <{level = 10 : i32, message = "gqk,gke->gqe"}> : () -> ()
    %cst_12 = arith.constant dense<0.000000e+00> : vector<8x8x8xf32>
    %38 = tpu.matmul %37, %25, %cst_12 {dimension_numbers = #tpu.dot_dimension_numbers<[2], [1], [1], [2], [0, 0, 0, 1, 1, 2], [0], [0]>} : vector<8x8x8xbf16>, vector<8x8x8xbf16>, vector<8x8x8xf32> -> vector<8x8x8xf32>
    "tpu.trace_stop"() : () -> ()
    %39 = vector.shape_cast %38 : vector<8x8x8xf32> to vector<2x4x8x8xf32>
    %40 = tpu.transpose %39, [0, 2, 1, 3] : vector<2x4x8x8xf32> -> vector<2x8x4x8xf32>
    %41 = vector.shape_cast %40 : vector<2x8x4x8xf32> to vector<16x32xf32>
    %42 = arith.truncf %41 : vector<16x32xf32> to vector<16x32xbf16>
    %c0_13 = arith.constant 0 : index
    %c0_14 = arith.constant 0 : index
    %c0_15 = arith.constant 0 : index
    %43 = vector.load %arg5[%c0_13, %c0_14, %c0_15] : memref<1x32x32xbf16, #tpu.memory_space<vmem>>, vector<1x32x32xbf16>
    %44 = vector.shape_cast %43 : vector<1x32x32xbf16> to vector<32x32xbf16>
    %cst_16 = arith.constant dense<0.000000e+00> : vector<16x32xf32>
    %45 = tpu.matmul %42, %44, %cst_16 {dimension_numbers = #tpu.dot_dimension_numbers<[1], [0], [0], [1], [0, 0, 1, 1], [], []>} : vector<16x32xbf16>, vector<32x32xbf16>, vector<16x32xf32> -> vector<16x32xf32>
    %c0_17 = arith.constant 0 : index
    %c0_18 = arith.constant 0 : index
    %c0_19 = arith.constant 0 : index
    %46 = vector.load %arg6[%c0_17, %c0_18, %c0_19] : memref<1x1x32xf32, #tpu.memory_space<vmem>>, vector<1x1x32xf32>
    %47 = vector.shape_cast %46 : vector<1x1x32xf32> to vector<1x32xf32>
    %48 = vector.broadcast %47 : vector<1x32xf32> to vector<16x32xf32>
    %49 = arith.addf %45, %48 : vector<16x32xf32>
    %50 = arith.addf %4, %49 : vector<16x32xf32>
    %c0_20 = arith.constant 0 : index
    %c0_21 = arith.constant 0 : index
    %c0_22 = arith.constant 0 : index
    %51 = vector.load %arg11[%c0_20, %c0_21, %c0_22] : memref<1x1x32xf32, #tpu.memory_space<vmem>>, vector<1x1x32xf32>
    %52 = vector.shape_cast %51 : vector<1x1x32xf32> to vector<1x32xf32>
    %c0_23 = arith.constant 0 : index
    %c0_24 = arith.constant 0 : index
    %c0_25 = arith.constant 0 : index
    %53 = vector.load %arg12[%c0_23, %c0_24, %c0_25] : memref<1x1x32xf32, #tpu.memory_space<vmem>>, vector<1x1x32xf32>
    %54 = vector.shape_cast %53 : vector<1x1x32xf32> to vector<1x32xf32>
    %cst_26 = arith.constant dense<0.000000e+00> : vector<16xf32>
    %55 = vector.multi_reduction <add>, %50, %cst_26 [1] : vector<16x32xf32> to vector<16xf32>
    %56 = vector.shape_cast %55 : vector<16xf32> to vector<16x1xf32>
    %cst_27 = arith.constant 3.200000e+01 : f32
    %57 = vector.broadcast %cst_27 : f32 to vector<16x1xf32>
    %58 = arith.divf %56, %57 : vector<16x1xf32>
    %59 = vector.broadcast %58 : vector<16x1xf32> to vector<16x32xf32>
    %60 = arith.subf %50, %59 : vector<16x32xf32>
    %61 = arith.mulf %60, %60 : vector<16x32xf32>
    %cst_28 = arith.constant dense<0.000000e+00> : vector<16xf32>
    %62 = vector.multi_reduction <add>, %61, %cst_28 [1] : vector<16x32xf32> to vector<16xf32>
    %63 = vector.shape_cast %62 : vector<16xf32> to vector<16x1xf32>
    %cst_29 = arith.constant 3.200000e+01 : f32
    %64 = vector.broadcast %cst_29 : f32 to vector<16x1xf32>
    %65 = arith.divf %63, %64 : vector<16x1xf32>
    %66 = vector.broadcast %58 : vector<16x1xf32> to vector<16x32xf32>
    %67 = arith.subf %50, %66 : vector<16x32xf32>
    %cst_30 = arith.constant 9.99999974E-6 : f32
    %68 = vector.broadcast %cst_30 : f32 to vector<16x1xf32>
    %69 = arith.addf %65, %68 : vector<16x1xf32>
    %70 = math.rsqrt %69 : vector<16x1xf32>
    %71 = vector.broadcast %70 : vector<16x1xf32> to vector<16x32xf32>
    %72 = arith.mulf %67, %71 : vector<16x32xf32>
    %73 = vector.broadcast %52 : vector<1x32xf32> to vector<16x32xf32>
    %74 = arith.mulf %72, %73 : vector<16x32xf32>
    %75 = vector.broadcast %54 : vector<1x32xf32> to vector<16x32xf32>
    %76 = arith.addf %74, %75 : vector<16x32xf32>
    %77 = arith.truncf %76 : vector<16x32xf32> to vector<16x32xbf16>
    %c0_31 = arith.constant 0 : index
    %c0_32 = arith.constant 0 : index
    %c0_33 = arith.constant 0 : index
    %78 = vector.load %arg7[%c0_31, %c0_32, %c0_33] : memref<1x32x64xbf16, #tpu.memory_space<vmem>>, vector<1x32x64xbf16>
    %79 = vector.shape_cast %78 : vector<1x32x64xbf16> to vector<32x64xbf16>
    %cst_34 = arith.constant dense<0.000000e+00> : vector<16x64xf32>
    %80 = tpu.matmul %77, %79, %cst_34 {dimension_numbers = #tpu.dot_dimension_numbers<[1], [0], [0], [1], [0, 0, 1, 1], [], []>} : vector<16x32xbf16>, vector<32x64xbf16>, vector<16x64xf32> -> vector<16x64xf32>
    %c0_35 = arith.constant 0 : index
    %c0_36 = arith.constant 0 : index
    %c0_37 = arith.constant 0 : index
    %81 = vector.load %arg8[%c0_35, %c0_36, %c0_37] : memref<1x1x64xf32, #tpu.memory_space<vmem>>, vector<1x1x64xf32>
    %82 = vector.shape_cast %81 : vector<1x1x64xf32> to vector<1x64xf32>
    %83 = vector.broadcast %82 : vector<1x64xf32> to vector<16x64xf32>
    %84 = arith.addf %80, %83 : vector<16x64xf32>
    %cst_38 = arith.constant 0.000000e+00 : f32
    %85 = vector.broadcast %cst_38 : f32 to vector<16x64xf32>
    %86 = arith.maximumf %84, %85 : vector<16x64xf32>
    %87 = arith.truncf %86 : vector<16x64xf32> to vector<16x64xbf16>
    %c0_39 = arith.constant 0 : index
    %c0_40 = arith.constant 0 : index
    %c0_41 = arith.constant 0 : index
    %88 = vector.load %arg9[%c0_39, %c0_40, %c0_41] : memref<1x64x32xbf16, #tpu.memory_space<vmem>>, vector<1x64x32xbf16>
    %89 = vector.shape_cast %88 : vector<1x64x32xbf16> to vector<64x32xbf16>
    %cst_42 = arith.constant dense<0.000000e+00> : vector<16x32xf32>
    %90 = tpu.matmul %87, %89, %cst_42 {dimension_numbers = #tpu.dot_dimension_numbers<[1], [0], [0], [1], [0, 0, 1, 1], [], []>} : vector<16x64xbf16>, vector<64x32xbf16>, vector<16x32xf32> -> vector<16x32xf32>
    %c0_43 = arith.constant 0 : index
    %c0_44 = arith.constant 0 : index
    %c0_45 = arith.constant 0 : index
    %91 = vector.load %arg10[%c0_43, %c0_44, %c0_45] : memref<1x1x32xf32, #tpu.memory_space<vmem>>, vector<1x1x32xf32>
    %92 = vector.shape_cast %91 : vector<1x1x32xf32> to vector<1x32xf32>
    %93 = vector.broadcast %92 : vector<1x32xf32> to vector<16x32xf32>
    %94 = arith.addf %90, %93 : vector<16x32xf32>
    %95 = arith.addf %76, %94 : vector<16x32xf32>
    %c0_46 = arith.constant 0 : index
    %c0_47 = arith.constant 0 : index
    %c0_48 = arith.constant 0 : index
    %96 = vector.load %arg13[%c0_46, %c0_47, %c0_48] : memref<1x1x32xf32, #tpu.memory_space<vmem>>, vector<1x1x32xf32>
    %97 = vector.shape_cast %96 : vector<1x1x32xf32> to vector<1x32xf32>
    %c0_49 = arith.constant 0 : index
    %c0_50 = arith.constant 0 : index
    %c0_51 = arith.constant 0 : index
    %98 = vector.load %arg14[%c0_49, %c0_50, %c0_51] : memref<1x1x32xf32, #tpu.memory_space<vmem>>, vector<1x1x32xf32>
    %99 = vector.shape_cast %98 : vector<1x1x32xf32> to vector<1x32xf32>
    %cst_52 = arith.constant dense<0.000000e+00> : vector<16xf32>
    %100 = vector.multi_reduction <add>, %95, %cst_52 [1] : vector<16x32xf32> to vector<16xf32>
    %101 = vector.shape_cast %100 : vector<16xf32> to vector<16x1xf32>
    %cst_53 = arith.constant 3.200000e+01 : f32
    %102 = vector.broadcast %cst_53 : f32 to vector<16x1xf32>
    %103 = arith.divf %101, %102 : vector<16x1xf32>
    %104 = vector.broadcast %103 : vector<16x1xf32> to vector<16x32xf32>
    %105 = arith.subf %95, %104 : vector<16x32xf32>
    %106 = arith.mulf %105, %105 : vector<16x32xf32>
    %cst_54 = arith.constant dense<0.000000e+00> : vector<16xf32>
    %107 = vector.multi_reduction <add>, %106, %cst_54 [1] : vector<16x32xf32> to vector<16xf32>
    %108 = vector.shape_cast %107 : vector<16xf32> to vector<16x1xf32>
    %cst_55 = arith.constant 3.200000e+01 : f32
    %109 = vector.broadcast %cst_55 : f32 to vector<16x1xf32>
    %110 = arith.divf %108, %109 : vector<16x1xf32>
    %111 = vector.broadcast %103 : vector<16x1xf32> to vector<16x32xf32>
    %112 = arith.subf %95, %111 : vector<16x32xf32>
    %cst_56 = arith.constant 9.99999974E-6 : f32
    %113 = vector.broadcast %cst_56 : f32 to vector<16x1xf32>
    %114 = arith.addf %110, %113 : vector<16x1xf32>
    %115 = math.rsqrt %114 : vector<16x1xf32>
    %116 = vector.broadcast %115 : vector<16x1xf32> to vector<16x32xf32>
    %117 = arith.mulf %112, %116 : vector<16x32xf32>
    %118 = vector.broadcast %97 : vector<1x32xf32> to vector<16x32xf32>
    %119 = arith.mulf %117, %118 : vector<16x32xf32>
    %120 = vector.broadcast %99 : vector<1x32xf32> to vector<16x32xf32>
    %121 = arith.addf %119, %120 : vector<16x32xf32>
    %122 = vector.shape_cast %121 : vector<16x32xf32> to vector<2x8x32xf32>
    %c0_57 = arith.constant 0 : index
    %c0_58 = arith.constant 0 : index
    %c0_59 = arith.constant 0 : index
    %123 = vector.load %arg15[%c0_57, %c0_58, %c0_59] : memref<2x8x32xf32, #tpu.memory_space<vmem>>, vector<2x8x32xf32>
    tpu.vector_store %arg15[%c0_57, %c0_58, %c0_59], %122 {strides = array<i32>} : memref<2x8x32xf32, #tpu.memory_space<vmem>>, vector<2x8x32xf32>,
    return
  }
  func.func @transform_0(%arg0: i32, %arg1: i32) -> (i32, i32, i32) {
    %c0_i32 = arith.constant 0 : i32
    %c0_i32_0 = arith.constant 0 : i32
    %c0_i32_1 = arith.constant 0 : i32
    return %arg0, %c0_i32, %c0_i32_0 : i32, i32, i32
  }
  func.func @transform_1(%arg0: i32, %arg1: i32) -> (i32, i32, i32) {
    %c0_i32 = arith.constant 0 : i32
    %c0_i32_0 = arith.constant 0 : i32
    %c0_i32_1 = arith.constant 0 : i32
    return %arg1, %c0_i32, %c0_i32_0 : i32, i32, i32
  }
  func.func @transform_2(%arg0: i32, %arg1: i32) -> (i32, i32, i32) {
    %c0_i32 = arith.constant 0 : i32
    %c0_i32_0 = arith.constant 0 : i32
    %c0_i32_1 = arith.constant 0 : i32
    return %arg1, %c0_i32, %c0_i32_0 : i32, i32, i32
  }
  func.func @transform_3(%arg0: i32, %arg1: i32) -> (i32, i32, i32) {
    %c0_i32 = arith.constant 0 : i32
    %c0_i32_0 = arith.constant 0 : i32
    %c0_i32_1 = arith.constant 0 : i32
    return %arg1, %c0_i32, %c0_i32_0 : i32, i32, i32
  }
  func.func @transform_4(%arg0: i32, %arg1: i32) -> (i32, i32, i32) {
    %c0_i32 = arith.constant 0 : i32
    %c0_i32_0 = arith.constant 0 : i32
    %c0_i32_1 = arith.constant 0 : i32
    return %arg1, %c0_i32, %c0_i32_0 : i32, i32, i32
  }
  func.func @transform_5(%arg0: i32, %arg1: i32) -> (i32, i32, i32) {
    %c0_i32 = arith.constant 0 : i32
    %c0_i32_0 = arith.constant 0 : i32
    %c0_i32_1 = arith.constant 0 : i32
    return %arg1, %c0_i32, %c0_i32_0 : i32, i32, i32
  }
  func.func @transform_6(%arg0: i32, %arg1: i32) -> (i32, i32, i32) {
    %c0_i32 = arith.constant 0 : i32
    %c0_i32_0 = arith.constant 0 : i32
    %c0_i32_1 = arith.constant 0 : i32
    return %arg1, %c0_i32, %c0_i32_0 : i32, i32, i32
  }
  func.func @transform_7(%arg0: i32, %arg1: i32) -> (i32, i32, i32) {
    %c0_i32 = arith.constant 0 : i32
    %c0_i32_0 = arith.constant 0 : i32
    %c0_i32_1 = arith.constant 0 : i32
    return %arg1, %c0_i32, %c0_i32_0 : i32, i32, i32
  }
  func.func @transform_8(%arg0: i32, %arg1: i32) -> (i32, i32, i32) {
    %c0_i32 = arith.constant 0 : i32
    %c0_i32_0 = arith.constant 0 : i32
    %c0_i32_1 = arith.constant 0 : i32
    return %arg1, %c0_i32, %c0_i32_0 : i32, i32, i32
  }
  func.func @transform_9(%arg0: i32, %arg1: i32) -> (i32, i32, i32) {
    %c0_i32 = arith.constant 0 : i32
    %c0_i32_0 = arith.constant 0 : i32
    %c0_i32_1 = arith.constant 0 : i32
    return %arg1, %c0_i32, %c0_i32_0 : i32, i32, i32
  }
  func.func @transform_10(%arg0: i32, %arg1: i32) -> (i32, i32, i32) {
    %c0_i32 = arith.constant 0 : i32
    %c0_i32_0 = arith.constant 0 : i32
    %c0_i32_1 = arith.constant 0 : i32
    return %arg1, %c0_i32, %c0_i32_0 : i32, i32, i32
  }
  func.func @transform_11(%arg0: i32, %arg1: i32) -> (i32, i32, i32) {
    %c0_i32 = arith.constant 0 : i32
    %c0_i32_0 = arith.constant 0 : i32
    %c0_i32_1 = arith.constant 0 : i32
    return %arg1, %c0_i32, %c0_i32_0 : i32, i32, i32
  }
  func.func @transform_12(%arg0: i32, %arg1: i32) -> (i32, i32, i32) {
    %c0_i32 = arith.constant 0 : i32
    %c0_i32_0 = arith.constant 0 : i32
    %c0_i32_1 = arith.constant 0 : i32
    return %arg1, %c0_i32, %c0_i32_0 : i32, i32, i32
  }
  func.func @transform_13(%arg0: i32, %arg1: i32) -> (i32, i32, i32) {
    %c0_i32 = arith.constant 0 : i32
    %c0_i32_0 = arith.constant 0 : i32
    %c0_i32_1 = arith.constant 0 : i32
    return %arg0, %c0_i32, %c0_i32_0 : i32, i32, i32
  }
}

</mosaic_0001>

<bundles_post_ra>
// kernel: tpu_custom_call.1
= control target key start
LH: loop header
LB: loop body
LE: loop exit
PB: predicated region body
PF: predicated region fallthrough
CT: control target
= control target key end

     0   :  { %s3890_s0 = inlined_call_operand.hbm [shape: f32[2,8,32], index: 0, kind: input, shape index: {}]   ;;  %s3891_s1 = inlined_call_operand.vmem [shape: bf16[2,32,96], index: 1, kind: input, shape index: {}]   ;;  %s3892_s2 = inlined_call_operand.hbm [shape: f32[2,1,96], index: 2, kind: input, shape index: {}]   ;;  %s3893_s3 = inlined_call_operand.vmem [shape: bf16[2,32,32], index: 3, kind: input, shape index: {}]   ;;  %s3894_s4 = inlined_call_operand.vmem [shape: f32[2,1,32], index: 4, kind: input, shape index: {}]   ;;  %s3895_s5 = inlined_call_operand.vmem [shape: bf16[2,32,64], index: 5, kind: input, shape index: {}]   ;;  %s3896_s6 = inlined_call_operand.vmem [shape: f32[2,1,64], index: 6, kind: input, shape index: {}]   ;;  %s3897_s7 = inlined_call_operand.vmem [shape: bf16[2,64,32], index: 7, kind: input, shape index: {}]   ;;  %s3898_s8 = inlined_call_operand.vmem [shape: f32[2,1,32], index: 8, kind: input, shape index: {}]   ;;  %s3899_s9 = inlined_call_operand.hbm [shape: f32[2,1,32], index: 9, kind: input, shape index: {}]   ;;  %s3900_s10 = inlined_call_operand.vmem [shape: f32[2,1,32], index: 10, kind: input, shape index: {}]   ;;  %s3901_s11 = inlined_call_operand.hbm [shape: f32[2,1,32], index: 11, kind: input, shape index: {}]   ;;  %s3902_s12 = inlined_call_operand.vmem [shape: f32[2,1,32], index: 12, kind: input, shape index: {}]   ;;  %s3903_s13 = inlined_call_operand.hbm [shape: f32[2,8,32], index: 13, kind: output, shape index: {}]  }
   0x1   :  { %3907 = sst [smem:[#allocation19_spill]] %s3890_s0 }
   0x2   :  { %3908 = sst [smem:[#allocation20_spill]] %s3891_s1 }
   0x3   :  { %3909 = sst [smem:[#allocation21_spill]] %s3892_s2 }
   0x4   :  { %3910 = sst [smem:[#allocation22_spill]] %s3893_s3 }
   0x5   :  { %3911 = sst [smem:[#allocation23_spill]] %s3895_s5 }
   0x6   :  { %3912 = sst [smem:[#allocation24_spill]] %s3897_s7 }
   0x7   :  { %3913 = sst [smem:[#allocation25_spill]] %s3898_s8 }
   0x8   :  { %3914 = sst [smem:[#allocation26_spill]] %s3899_s9 }
   0x9   :  { %3915 = sst [smem:[#allocation27_spill]] %s3900_s10 }
   0xa   :  { %3916 = sst [smem:[#allocation28_spill]] %s3901_s11 }
   0xb   :  { %3917 = sst [smem:[#allocation29_spill]] %s3902_s12 }
   0xc   :  { %3918 = sst [smem:[#allocation30_spill]] %s3903_s13 }
   0xd   :  { %18 = vsyncpa [#allocation3], 0 }
   0xe   :  { %19 = vsyncpa [#allocation6], 0 }
   0xf   :  { %21 = vsyncpa [#allocation6 + $0x1], 0 }
  0x10   :  { %22 = vsyncpa [#allocation9], 0 }
  0x11   :  { %24 = vsyncpa [#allocation9 + $0x1], 0 }
  0x12   :  { %25 = vsyncpa [#allocation4], 0  ;;  %s3168_s25 = smov 0   ;;  %s3170_s26 = smov 0  }
  0x13   :  { %s3172_s27 = smov 0   ;;  %s3174_s28 = smov 0  }
  0x14   :  { %s3176_s29 = smov 0   ;;  %s3178_s30 = smov 0  }
  0x15 LB: > { %3919 = sst [smem:[#allocation15_spill]] %s3068_s27  ;;  %s40_s14 = sadd.s32 1, %s3076_s29  ;;  %s3080_s30 = sphi %s3178_s30, %s31_s30   ;;  %s3076_s29 = sphi %s3176_s29, %s3953_s29   ;;  %s3072_s28 = sphi %s3174_s28, %s3952_s28   ;;  %s3068_s27 = sphi %s3172_s27, %s3948_s27   ;;  %s3064_s26 = sphi %s3170_s26, %s3951_s26   ;;  %s3060_s25 = sphi %s3168_s25, %s3950_s25  }
  0x16   : > { %3920 = sst [smem:[#allocation16_spill]] %s3080_s30  ;;  %s102_s15 = sadd.s32 1, %s3068_s27 }
  0x17   : > { %p41_p0 = scmp.ge.s32.totalorder %s40_s14, 2  ;;  %p109_p1 = scmp.ne.s32.totalorder %s3068_s27, %s3064_s26 }
  0x18   : > { %p110_p2 = scmp.eq.s32.totalorder %s3080_s30, 0  ;;  %p115_p3 = scmp.ne.s32.totalorder %s3064_s26, %s3060_s25 }
  0x19   : > { %s3955_s14 = smov (%p41_p0, %s40_s14), 0  ;;  %p2735_p5 = scmp.lt.s32.totalorder %s3080_s30, 2 }
  0x1a   : > { %3921 = sst [smem:[#allocation17_spill]] %s3955_s14  ;;  %p3207_p4 = por %p110_p2, %p109_p1 }
  0x1b   : > { %s99_s17 = ssub.s32 %s3076_s29, %s3955_s14  ;;  %s450_s18 = sand.u32 1, %s3080_s30  }
  0x1c   : > { %p100_p6 = scmp.eq.s32.totalorder %s99_s17, 0  ;;  %s3216_s19 = sand.u32 1, %s3068_s27  }
  0x1d   : > { %s3924_s2 = sld [smem:[#allocation21_spill]]  ;;  %s453_s13 = scalar_lea.vmem [#allocation5], %s3216_s19 }
  0x1e   : > { %s3219_s20 = scalar_select %p100_p6, %s3068_s27, %s102_s15  }
  0x1f   : > { %s460_s12 = sshll.u32 %s453_s13, 4  ;;  %p3228_p7 = pnand %p2735_p5, %p3207_p4  ;;  %s461_s12 = int_to_ptr.vmem [resolvable:$true] %s460_s12 }
  0x20   : > { %3923 = sst [smem:[#allocation18_spill]] %s3219_s20  ;;  %s3233_s14 = sadd.s32 4294967295, %s3080_s30  }
  0x21   : > { %p116_p8 = scmp.eq.s32.totalorder %s3233_s14, 0  ;;  %s451_s15 = scalar_lea.sflag [#allocation6], %s450_s18 }
  0x22   : > { %p2614_p10 = scmp.ge.s32.totalorder %s3080_s30, 1  ;;  %p412_p11 = scmp.lt.s32.totalorder %s3080_s30, 3 }
  0x23   : > { %s456_s23 = scalar_lea.hbm %s3924_s2, %s3076_s29  ;;  %p3243_p9 = por %p116_p8, %p115_p3 }
  0x24   : > { %s458_s24 = sshll.u32 %s456_s23, 4  ;;  %s3927_s0 = sld [smem:[#allocation19_spill]]  ;;  %s459_s24 = int_to_ptr.hbm [resolvable:$true] %s458_s24 }
  0x25   : > { %2727 = dma.hbm_to_vmem [thread:$0]  (!%p3228_p7), %s459_s24, 16, %s461_s12, %s451_s15  }
  0x26   : > { %p3252_p12 = pnand %p2614_p10, %p412_p11  ;;  %s3082_s12 = smov [#allocation2]  }
  0x27   : > { %s428_s25 = sshll.u32 %s3082_s12, 4  ;;  %s3929_s9 = sld [smem:[#allocation26_spill]]  ;;  %s429_s25 = int_to_ptr.vmem [resolvable:$true] %s428_s25 }
  0x28   : > { %p2720_p13 = pneg %p3252_p12  ;;  %s3083_s20 = smov 128  }
  0x29   : > { %s3084_s27 = smov 8   ;;  %s3930_s11 = sld [smem:[#allocation28_spill]] }
  0x2a   : > { %s426_s22 = sshll.u32 %s3927_s0, 4  ;;  %p2721_p0 = pnand %p2720_p13, %p116_p8  ;;  %s427_s22 = int_to_ptr.hbm [resolvable:$true] %s426_s22 }
  0x2b   : > { %s512_s0 = scalar_lea.vmem [#allocation7], %s3216_s19  ;;  %s535_s8 = scalar_lea.vmem [#allocation8], %s3216_s19 }
  0x2c   : > { %s519_s2 = sshll.u32 %s512_s0, 4  ;;  %s542_s18 = sshll.u32 %s535_s8, 4  ;;  %s520_s2 = int_to_ptr.vmem [resolvable:$true] %s519_s2  ;;  %s543_s18 = int_to_ptr.vmem [resolvable:$true] %s542_s18 }
  0x2d   : > { %s515_s16 = scalar_lea.hbm %s3929_s9, %s3076_s29  ;;  %s533_s24 = scalar_lea.sflag [#allocation9], %s3216_s19 }
  0x2e   : > { %s517_s21 = sshll.u32 %s515_s16, 4  ;;  %s518_s21 = int_to_ptr.hbm [resolvable:$true] %s517_s21 }
  0x2f   : > { %2723 = dma.hbm_to_vmem [thread:$0]  (!%p2721_p0), %s427_s22, 256, %s429_s25, [#allocation3], %s3083_s20, %s3083_s20, %s3084_s27  }
  0x30   : > { %2730 = dma.hbm_to_vmem [thread:$0]  (!%p3228_p7), %s518_s21, 16, %s520_s2, %s451_s15  }
  0x31   : > { %s538_s10 = scalar_lea.hbm %s3930_s11, %s3076_s29  ;;  %557 = sbr.rel (%p3252_p12) target bundleno = 2154 (0x86a), region = 72 }
  0x32   : > { %s540_s7 = sshll.u32 %s538_s10, 4  ;;  %s541_s7 = int_to_ptr.hbm [resolvable:$true] %s540_s7 }
  0x33   : > { %2733 = dma.hbm_to_vmem [thread:$0]  (!%p3228_p7), %s541_s7, 16, %s543_s18, %s533_s24  }
  0x36   : > { %3043 = dma.done.wait (%p116_p8), [#allocation3], 256  }
  0x37   : > { %3045 = vsyncadd (%p116_p8), [#allocation3], 4294967040  ;;  %s564_s0 = sand.u32 1, %s3233_s14   ;;  %s3283_s2 = sand.u32 1, %s3064_s26  }
  0x38   : > { %s565_s8 = scalar_lea.sflag [#allocation6], %s564_s0 }
  0x39   : > { %3047 = dma.done.wait (%p3243_p9), %s565_s8, 32  }
  0x3a   : > { %3049 = vsyncadd (%p3243_p9), %s565_s8, 4294967264  ;;  %s583_s27 = scalar_lea.sflag [#allocation9], %s3283_s2 }
  0x3b   : > { %3051 = dma.done.wait (%p3243_p9), %s583_s27, 16  }
  0x3c   : > { %3053 = vsyncadd (%p3243_p9), %s583_s27, 4294967280  ;;  %p667_p1 = scmp.lt.s32.totalorder %s3072_s28, 1  ;;  %s3931_s1 = sld [smem:[#allocation20_spill]] }
  0x3d   : > { %s3932_s3 = sld [smem:[#allocation22_spill]]  ;;  %p2627_p2 = scmp.ne.s32.totalorder %s3072_s28, 0 }
  0x3e   : > { %s3299_s19 = scalar_select %p667_p1, %s3072_s28, 1 }
  0x3f   : > { %s3933_s5 = sld [smem:[#allocation23_spill]] }
  0x40   : > { %s2692_s20 = sshll.u32 %s3299_s19, 4  ;;  %s687_s30 = scalar_lea.vmem %s3896_s6, %s3299_s19 }
  0x41   : > { %s2695_s17 = sshll.u32 %s3299_s19, 5  ;;  %s3934_s22 = sld [smem:[#allocation25_spill]] }
  0x42   : > { %s671_s25 = scalar_lea.vmem %s3931_s1, %s2692_s20  ;;  %s3935_s1 = sld [smem:[#allocation24_spill]] }
  0x43   : > { %s3312_s12 = scalar_lea.vmem %s3932_s3, %s2692_s20  ;;  %s3936_s9 = sld [smem:[#allocation27_spill]] }
  0x45   : > { %s3317_s0 = scalar_lea.vmem %s3933_s5, %s2692_s20  ;;  %s3937_s5 = sld [smem:[#allocation29_spill]] }
  0x47   : > { %s695_s23 = scalar_lea.vmem %s3934_s22, %s3299_s19  ;;  %707 = sbr.rel (%p2627_p2) target bundleno = 79 (0x4f), region = 92 }
  0x48   : > { %s3331_s16 = scalar_lea.vmem %s3935_s1, %s2695_s17 }
  0x49   : > { %s698_s18 = scalar_lea.vmem %s3936_s9, %s3299_s19 }
  0x4b   : > { %s701_s11 = scalar_lea.vmem %s3937_s5, %s3299_s19 }
  0x4c   : > { %v708_v0 = vld [vmem:[#allocation2] sm:$0xff]  ;;  %vm710_vm0 = vcmask 261120   ;;  %v709_v1 = vld [vmem:[#allocation2 + $0x8] sm:$0xff] }
  0x4d   : > { %711 = vst.msk [vmem:[#allocation10] sm:$0xff] %vm710_vm0, %v708_v0 }
  0x4e   : > { %712 = vst.msk [vmem:[#allocation10 + $0x8] sm:$0xff] %vm710_vm0, %v709_v1 }
  0x4f PF: > { %v2697_v2 = vld [vmem:[%s671_s25 + $0x8] sm:$0xff]  ;;  %v2696_v3 = vld [vmem:[%s671_s25] sm:$0xff]  ;;  %vm736_vm1 = vcmask 261120   ;;  %s3938_s1 = scalar_lea.vmem [#allocation5], %s3283_s2  ;;  %s3085_s3 = smov 104   ;;  %vm805_vm2 = vcmask 1047556  }
  0x50   : > { %746 = vmatpush.bf16.msra.mxu0 %v2697_v2  ;;  %v2818_v7 = vld [vmem:[%s3938_s1] ss:$0 sm:$0xff]  ;;  %s3086_s5 = smov 120   ;;  %s3087_s9 = smov 112   ;;  %v3089_v16 = vmov 1983009808  }
  0x51   : > { %s3088_s28 = smov 96   ;;  %v796_v17 = vunpack.c.l.s4 %v3089_v16  ;;  %v3090_v23 = vmov 1934713408   ;;  %s3091_s10 = smov 64   ;;  %vm1487_vm3 = vcmask 64512   ;;  %vm1739_vm4 = vcmask 1043456  }
  0x52   : > { %v810_v24 = vunpack.c.l.s4 %v3090_v23  ;;  %s3092_s7 = smov 16   ;;  %s3093_s22 = smov 24   ;;  %vm2136_vm5 = vcmask 130048   ;;  %vm2139_vm6 = vcmask 195584   ;;  %vm2322_vm14 = vcmask 523264  }
  0x53   : > { %v3355_v21 = vunpack.c.0.s8 %v796_v17  ;;  %s3094_s25 = smov 8   ;;  %s3939_s27 = scalar_lea.vmem %s3894_s4, %s3299_s19 }
  0x54   : > { %v713_v4 = vld [vmem:[#allocation10] sm:$0xff]  ;;  %747 = vmatpush.bf16.msra.mxu0 %v2696_v3  ;;  %v3363_v31 = vunpack.c.0.s8 %v810_v24  ;;  %s3945_s19 = sld [smem:[#allocation30_spill]]  ;;  %p2737_p3 = scmp.eq.s32.totalorder %s3233_s14, 1 }
  0x55   : > { %v714_v5 = vld [vmem:[#allocation10 + $0x8] sm:$0xff] }
  0x56   : > { %v715_v6 = vpack.c.bf16 %v714_v5, %v713_v4 }
  0x58   : > { %2636 = vmatmul.msk.bf16.vlgmr.msra.gmra.mxu0 %vm736_vm1, %v715_v6 }
  0xd5   : > { %v749_v8 = vpop.f32.mrf.mxu0 }
  0xd6   : > { %v750_v9 = vadd.f32 %v2818_v7, %v749_v8 }
  0xd8   : > { %v754_v10 = vpack.c.bf16 %v750_v9, %v750_v9 }
  0xda   : > { %766 = vrot.lane.b32.xlu1 %v754_v10, %s3085_s3  ;;  %758 = vrot.lane.b32.xlu0 %v754_v10, %s3086_s5  ;;  %v773_v22 = vshrl.u32 %v754_v10, 16 }
  0xdd   : > { %v751_v11 = vpop.f32.mrf.mxu0 }
  0xde   : > { %v752_v12 = vadd.f32 %v2818_v7, %v751_v11 }
  0xe0   : > { %v3345_v13 = vpack.c.bf16 %v752_v12, %v752_v12 }
  0xe2   : > { %764 = vrot.lane.b32.xlu2 %v3345_v13, %s3087_s9  ;;  %760 = vrot.lane.b32.xlu1 %v3345_v13, %s3086_s5 }
  0xe3   : > { %762 = vrot.lane.b32.xlu0 %v754_v10, %s3087_s9 }
  0xea   : > { %768 = vrot.lane.b32.xlu2 %v3345_v13, %s3085_s3 }
  0xeb   : > { %999 = vrot.lane.b32.xlu0 %v754_v10, %s3088_s28 }
 0x13c   : > { %v3353_v20 = vpop.permute.xlu2 %764 }
 0x144   : > { %v3370_v40 = vpop.permute.xlu2 %768 }
 0x14c   : > { %v767_v14 = vpop.permute.xlu1 %766  ;;  %v759_v15 = vpop.permute.xlu0 %758 }
 0x14d   : > { %1011 = vrot.lane.b32.xlu0 %v767_v14, %s3088_s28  ;;  %1003 = vrot.lane.b32.xlu1 %v759_v15, %s3088_s28  ;;  %v772_v18 = vpack.i.b16 %v759_v15, %v754_v10  ;;  %v774_v19 = vshrl.u32 %v759_v15, 16  ;;  %v780_v28 = vshrl.u32 %v767_v14, 16 }
 0x14f   : > { %v798_v25 = vperm.slane %v772_v18, %v3355_v21  ;;  %v775_v26 = vpack.i.b16 %v774_v19, %v773_v22 }
 0x151   : > { %v807_v32 = vrot.slane %v798_v25, 4  ;;  %v825_v35 = vperm.slane %v775_v26, %v3355_v21  ;;  %v785_v26 = vshrl.u32 %v3345_v13, 16 }
 0x153   : > { %v833_v42 = vrot.slane %v825_v35, 4 }
 0x154   : > { %v3373_v43 = vpop.permute.xlu1 %760 }
 0x155   : > { %v763_v27 = vpop.permute.xlu0 %762  ;;  %1009 = vrot.lane.b32.xlu0 %v3353_v20, %s3088_s28  ;;  %1001 = vrot.lane.b32.xlu1 %v3345_v13, %s3088_s28 }
 0x156   : > { %v778_v29 = vpack.i.b16 %v767_v14, %v763_v27  ;;  %v779_v30 = vshrl.u32 %v763_v27, 16  ;;  %1007 = vrot.lane.b32.xlu2 %v763_v27, %s3088_s28 }
 0x158   : > { %v781_v33 = vpack.i.b16 %v780_v28, %v779_v30  ;;  %v803_v34 = vperm.slane %v778_v29, %v3355_v21  ;;  %v792_v28 = vshrl.u32 %v3370_v40, 16  ;;  %v791_v29 = vshrl.u32 %v3353_v20, 16 }
 0x159   : > { %v784_v30 = vpack.i.b16 %v3373_v43, %v3345_v13 }
 0x15a   : > { %v804_v36 = vrot.slane %v803_v34, 4  ;;  %v808_v37 = vsel %vm805_vm2, %v803_v34, %v807_v32  ;;  %v830_v38 = vperm.slane %v781_v33, %v3355_v21  ;;  %v793_v33 = vpack.i.b16 %v792_v28, %v791_v29 }
 0x15b   : > { %v816_v39 = vperm.slane %v808_v37, %v3363_v31  ;;  %v851_v34 = vperm.slane %v784_v30, %v3355_v21 }
 0x15c   : > { %v806_v41 = vsel %vm805_vm2, %v804_v36, %v798_v25  ;;  %v831_v46 = vrot.slane %v830_v38, 4  ;;  %v834_v50 = vsel %vm805_vm2, %v830_v38, %v833_v42  ;;  %v786_v25 = vshrl.u32 %v3373_v43, 16 }
 0x15d   : > { %v812_v44 = vperm.slane %v806_v41, %v3363_v31  ;;  %v819_v45 = vrot.slane %v816_v39, 4  ;;  %1243 = vrot.lane.b32.xlu0 %v754_v10, %s3091_s10  ;;  %1013 = vrot.lane.b32.xlu1 %v3370_v40, %s3088_s28  ;;  %v842_v52 = vperm.slane %v834_v50, %v3363_v31  ;;  %v790_v36 = vpack.i.b16 %v3370_v40, %v3353_v20 }
 0x15e   : > { %1005 = vrot.lane.b32.xlu2 %v3373_v43, %s3088_s28  ;;  %v832_v49 = vsel %vm805_vm2, %v831_v46, %v825_v35  ;;  %v882_v37 = vperm.slane %v793_v33, %v3355_v21  ;;  %v859_v38 = vrot.slane %v851_v34, 4 }
 0x15f   : > { %v817_v47 = vrot.slane %v812_v44, 4  ;;  %v820_v48 = vsel %vm805_vm2, 0, %v819_v45  ;;  %v838_v51 = vperm.slane %v832_v49, %v3363_v31  ;;  %v899_v55 = vsel %vm805_vm2, %v819_v45, %v812_v44  ;;  %v1000_v44 = vpop.permute.xlu0 %999 }
 0x160   : > { %v904_v53 = vrot.slane %v820_v48, 4  ;;  %v845_v57 = vrot.slane %v842_v52, 4  ;;  %v903_v0 = vperm.slane %v899_v55, %v3355_v21  ;;  %v856_v41 = vperm.slane %v790_v36, %v3355_v21 }
 0x161   : > { %v818_v54 = vsel %vm805_vm2, 0, %v817_v47  ;;  %v843_v56 = vrot.slane %v838_v51, 4  ;;  %v1018_v55 = vshrl.u32 %v1000_v44, 16 }
 0x162   : > { %v905_v58 = vsel %vm805_vm2, %v904_v53, %v818_v54  ;;  %v846_v59 = vsel %vm805_vm2, 0, %v845_v57  ;;  %v918_v62 = vsel %vm805_vm2, %v845_v57, %v838_v51  ;;  %v860_v45 = vsel %vm805_vm2, %v856_v41, %v859_v38 }
 0x163   : > { %v844_v60 = vsel %vm805_vm2, 0, %v843_v56  ;;  %v909_v61 = vperm.slane %v905_v58, %v3355_v21  ;;  %v923_v63 = vrot.slane %v846_v59, 4  ;;  %v922_v6 = vperm.slane %v918_v62, %v3355_v21 }
 0x164   : > { %v868_v47 = vperm.slane %v860_v45, %v3363_v31  ;;  %v857_v50 = vrot.slane %v856_v41, 4 }
 0x165   : > { %1255 = vrot.lane.b32.xlu0 %v767_v14, %s3091_s10  ;;  %1247 = vrot.lane.b32.xlu1 %v759_v15, %s3091_s10  ;;  %v910_v1 = vrot.slane %v909_v61, 4  ;;  %v924_v2 = vsel %vm805_vm2, %v923_v63, %v844_v60 }
 0x166   : > { %1251 = vrot.lane.b32.xlu2 %v763_v27, %s3091_s10  ;;  %v928_v4 = vperm.slane %v924_v2, %v3355_v21  ;;  %v787_v27 = vpack.i.b16 %v786_v25, %v785_v26  ;;  %v858_v52 = vsel %vm805_vm2, %v857_v50, %v851_v34  ;;  %v871_v53 = vrot.slane %v868_v47, 4 }
 0x167   : > { %v911_v3 = vsel %vm805_vm2, %v910_v1, %v903_v0  ;;  %v864_v63 = vperm.slane %v858_v52, %v3363_v31 }
 0x168   : > { %v3401_v5 = vperm.slane %v911_v3, %v3363_v31  ;;  %v929_v7 = vrot.slane %v928_v4, 4  ;;  %v877_v32 = vperm.slane %v787_v27, %v3355_v21 }
 0x16a   : > { %v916_v8 = vrot.slane %v3401_v5, 4  ;;  %v930_v9 = vsel %vm805_vm2, %v929_v7, %v922_v6  ;;  %v978_v11 = vshrl.u32 %v3401_v5, 16  ;;  %v885_v35 = vrot.slane %v877_v32, 4 }
 0x16b   : > { %v3409_v10 = vperm.slane %v930_v9, %v3363_v31  ;;  %v872_v6 = vsel %vm805_vm2, 0, %v871_v53 }
 0x16c   : > { %v3416_v15 = vsel %vm805_vm2, 0, %v916_v8  ;;  %v886_v39 = vsel %vm805_vm2, %v882_v37, %v885_v35  ;;  %v942_v30 = vrot.slane %v872_v6, 4 }
 0x16d   : > { %1245 = vrot.lane.b32.xlu1 %v3345_v13, %s3091_s10  ;;  %v977_v12 = vpack.i.b16 %v3409_v10, %v3401_v5  ;;  %v979_v14 = vshrl.u32 %v3409_v10, 16  ;;  %v935_v16 = vrot.slane %v3409_v10, 4  ;;  %v984_v22 = vshrl.u32 %v3416_v15, 16 }
 0x16e   : > { %v894_v42 = vperm.slane %v886_v39, %v3363_v31  ;;  %v883_v13 = vrot.slane %v882_v37, 4 }
 0x16f   : > { %v3419_v17 = vpack.i.b16 %v979_v14, %v978_v11  ;;  %v3422_v18 = vsel %vm805_vm2, 0, %v935_v16  ;;  %v869_v16 = vrot.slane %v864_v63, 4 }
 0x170   : > { %v983_v19 = vpack.i.b16 %v3422_v18, %v3416_v15  ;;  %v985_v23 = vshrl.u32 %v3422_v18, 16  ;;  %v884_v46 = vsel %vm805_vm2, %v883_v13, %v877_v32  ;;  %v897_v48 = vrot.slane %v894_v42, 4 }
 0x171   : > { %v890_v51 = vperm.slane %v884_v46, %v3363_v31 }
 0x172   : > { %v3428_v24 = vpack.i.b16 %v985_v23, %v984_v22  ;;  %v898_v54 = vsel %vm805_vm2, 0, %v897_v48  ;;  %v3458_v23 = vsel %vm805_vm2, %v871_v53, %v864_v63 }
 0x173   : > { %v895_v0 = vrot.slane %v890_v51, 4  ;;  %v961_v7 = vrot.slane %v898_v54, 4  ;;  %v870_v54 = vsel %vm805_vm2, 0, %v869_v16 }
 0x175   : > { %v896_v22 = vsel %vm805_vm2, 0, %v895_v0 }
 0x176   : > { %v962_v36 = vsel %vm805_vm2, %v961_v7, %v896_v22 }
 0x177   : > { %v966_v47 = vperm.slane %v962_v36, %v3355_v21 }
 0x179   : > { %v967_v7 = vrot.slane %v966_v47, 4 }
 0x1b0   : > { %v1008_v49 = vpop.permute.xlu2 %1007 }
 0x1b1   : > { %v1024_v56 = vshrl.u32 %v1008_v49, 16 }
 0x1b8   : > { %v1006_v25 = vpop.permute.xlu2 %1005 }
 0x1b9   : > { %v1031_v37 = vshrl.u32 %v1006_v25, 16 }
 0x1bf   : > { %v1004_v57 = vpop.permute.xlu1 %1003  ;;  %v1012_v58 = vpop.permute.xlu0 %1011 }
 0x1c0   : > { %v1017_v59 = vpack.i.b16 %v1004_v57, %v1000_v44  ;;  %v1019_v60 = vshrl.u32 %v1004_v57, 16  ;;  %v1023_v61 = vpack.i.b16 %v1012_v58, %v1008_v49  ;;  %v1025_v62 = vshrl.u32 %v1012_v58, 16 }
 0x1c2   : > { %v1020_v1 = vpack.i.b16 %v1019_v60, %v1018_v55  ;;  %v1043_v2 = vperm.slane %v1017_v59, %v3355_v21  ;;  %v1026_v3 = vpack.i.b16 %v1025_v62, %v1024_v56  ;;  %v1048_v4 = vperm.slane %v1023_v61, %v3355_v21 }
 0x1c3   : > { %v941_v56 = vperm.slane %v3458_v23, %v3355_v21  ;;  %v3477_v59 = vsel %vm805_vm2, %v942_v30, %v870_v54  ;;  %v956_v60 = vsel %vm805_vm2, %v897_v48, %v890_v51 }
 0x1c4   : > { %v1051_v8 = vrot.slane %v1043_v2, 4  ;;  %v1069_v9 = vperm.slane %v1020_v1, %v3355_v21  ;;  %v1049_v11 = vrot.slane %v1048_v4, 4  ;;  %v1074_v14 = vperm.slane %v1026_v3, %v3355_v21 }
 0x1c6   : > { %v1077_v26 = vrot.slane %v1069_v9, 4  ;;  %v1050_v27 = vsel %vm805_vm2, %v1049_v11, %v1043_v2  ;;  %v1052_v28 = vsel %vm805_vm2, %v1048_v4, %v1051_v8  ;;  %v1075_v29 = vrot.slane %v1074_v14, 4 }
 0x1c7   : > { %v1056_v32 = vperm.slane %v1050_v27, %v3363_v31  ;;  %v1060_v33 = vperm.slane %v1052_v28, %v3363_v31  ;;  %v1002_v34 = vpop.permute.xlu1 %1001  ;;  %v1010_v35 = vpop.permute.xlu0 %1009  ;;  %v947_v28 = vperm.slane %v3477_v59, %v3355_v21 }
 0x1c8   : > { %v1076_v38 = vsel %vm805_vm2, %v1075_v29, %v1069_v9  ;;  %v1078_v39 = vsel %vm805_vm2, %v1074_v14, %v1077_v26  ;;  %v1030_v41 = vshrl.u32 %v1002_v34, 16  ;;  %v1029_v46 = vpack.i.b16 %v1006_v25, %v1002_v34 }
 0x1c9   : > { %v1061_v42 = vrot.slane %v1056_v32, 4  ;;  %v1063_v44 = vrot.slane %v1060_v33, 4  ;;  %v1082_v13 = vperm.slane %v1076_v38, %v3363_v31  ;;  %v1086_v45 = vperm.slane %v1078_v39, %v3363_v31 }
 0x1ca   : > { %v1032_v53 = vpack.i.b16 %v1031_v37, %v1030_v41  ;;  %v1095_v62 = vperm.slane %v1029_v46, %v3355_v21  ;;  %v1036_v8 = vshrl.u32 %v1010_v35, 16  ;;  %v960_v33 = vperm.slane %v956_v60, %v3355_v21 }
 0x1cb   : > { %v1064_v49 = vsel %vm805_vm2, 0, %v1063_v44  ;;  %v1087_v50 = vrot.slane %v1082_v13, 4  ;;  %v1089_v52 = vrot.slane %v1086_v45, 4  ;;  %v1062_v57 = vsel %vm805_vm2, 0, %v1061_v42  ;;  %v1252_v42 = vpop.permute.xlu2 %1251 }
 0x1cc   : > { %v1148_v55 = vrot.slane %v1064_v49, 4  ;;  %v1143_v63 = vsel %vm805_vm2, %v1063_v44, %v1056_v32  ;;  %v1121_v1 = vperm.slane %v1032_v53, %v3355_v21  ;;  %v1103_v25 = vrot.slane %v1095_v62, 4 }
 0x1cd   : > { %v1090_v58 = vsel %vm805_vm2, 0, %v1089_v52  ;;  %v1088_v4 = vsel %vm805_vm2, 0, %v1087_v50  ;;  %v1147_v51 = vperm.slane %v1143_v63, %v3355_v21  ;;  %v1162_v16 = vsel %vm805_vm2, %v1089_v52, %v1082_v13 }
 0x1ce   : > { %v1167_v61 = vrot.slane %v1090_v58, 4  ;;  %v1149_v0 = vsel %vm805_vm2, %v1148_v55, %v1062_v57  ;;  %v1129_v29 = vrot.slane %v1121_v1, 4  ;;  %v1166_v37 = vperm.slane %v1162_v16, %v3355_v21 }
 0x1cf   : > { %v1014_v2 = vpop.permute.xlu1 %1013  ;;  %v1244_v3 = vpop.permute.xlu0 %1243  ;;  %v1153_v6 = vperm.slane %v1149_v0, %v3355_v21  ;;  %v3501_v41 = vsel %vm805_vm2, %v967_v7, %v960_v33 }
 0x1d0   : > { %v1035_v9 = vpack.i.b16 %v1014_v2, %v1010_v35  ;;  %v1037_v11 = vshrl.u32 %v1014_v2, 16  ;;  %v1168_v48 = vsel %vm805_vm2, %v1167_v61, %v1088_v4  ;;  %v1262_v52 = vshrl.u32 %v1244_v3, 16 }
 0x1d1   : > { %v1154_v14 = vrot.slane %v1153_v6, 4  ;;  %v1172_v22 = vperm.slane %v1168_v48, %v3355_v21  ;;  %v1268_v61 = vshrl.u32 %v1252_v42, 16 }
 0x1d2   : > { %v1038_v26 = vpack.i.b16 %v1037_v11, %v1036_v8  ;;  %v1100_v27 = vperm.slane %v1035_v9, %v3355_v21 }
 0x1d3   : > { %v1155_v30 = vsel %vm805_vm2, %v1154_v14, %v1147_v51  ;;  %v1173_v32 = vrot.slane %v1172_v22, 4 }
 0x1d4   : > { %v1101_v34 = vrot.slane %v1100_v27, 4  ;;  %v1104_v35 = vsel %vm805_vm2, %v1100_v27, %v1103_v25  ;;  %v1126_v36 = vperm.slane %v1038_v26, %v3355_v21  ;;  %v1159_v39 = vperm.slane %v1155_v30, %v3363_v31 }
 0x1d5   : > { %v1112_v38 = vperm.slane %v1104_v35, %v3363_v31  ;;  %v1174_v46 = vsel %vm805_vm2, %v1173_v32, %v1166_v37 }
 0x1d6   : > { %v1102_v44 = vsel %vm805_vm2, %v1101_v34, %v1095_v62  ;;  %v1127_v13 = vrot.slane %v1126_v36, 4  ;;  %v1130_v45 = vsel %vm805_vm2, %v1126_v36, %v1129_v29  ;;  %v1178_v0 = vperm.slane %v1174_v46, %v3363_v31 }
 0x1d7   : > { %v3507_v47 = vperm.slane %v1102_v44, %v3363_v31  ;;  %v3509_v49 = vrot.slane %v1112_v38, 4  ;;  %v1138_v50 = vperm.slane %v1130_v45, %v3363_v31  ;;  %v1248_v53 = vpop.permute.xlu1 %1247  ;;  %v1256_v54 = vpop.permute.xlu0 %1255  ;;  %v1222_v7 = vshrl.u32 %v1159_v39, 16 }
 0x1d8   : > { %v1128_v55 = vsel %vm805_vm2, %v1127_v13, %v1121_v1  ;;  %v1261_v57 = vpack.i.b16 %v1248_v53, %v1244_v3  ;;  %v1263_v58 = vshrl.u32 %v1248_v53, 16  ;;  %v1267_v60 = vpack.i.b16 %v1256_v54, %v1252_v42 }
 0x1d9   : > { %v3515_v62 = vsel %vm805_vm2, 0, %v3509_v49  ;;  %v3517_v63 = vrot.slane %v1138_v50, 4  ;;  %v1269_v6 = vshrl.u32 %v1256_v54, 16  ;;  %v1113_v8 = vrot.slane %v3507_v47, 4 }
 0x1da   : > { %v1264_v2 = vpack.i.b16 %v1263_v58, %v1262_v52  ;;  %v1287_v4 = vperm.slane %v1261_v57, %v3355_v21  ;;  %v3523_v1 = vperm.slane %v1128_v55, %v3363_v31  ;;  %v1186_v3 = vrot.slane %v3515_v62, 4 }
 0x1db   : > { %v1292_v9 = vperm.slane %v1267_v60, %v3355_v21  ;;  %v1142_v11 = vsel %vm805_vm2, 0, %v3517_v63  ;;  %v1270_v14 = vpack.i.b16 %v1269_v6, %v1268_v61  ;;  %v1221_v22 = vpack.i.b16 %v1178_v0, %v1159_v39 }
 0x1dc   : > { %v1295_v48 = vrot.slane %v1287_v4, 4  ;;  %v1313_v51 = vperm.slane %v1264_v2, %v3355_v21  ;;  %v1223_v25 = vshrl.u32 %v1178_v0, 16  ;;  %v1160_v26 = vrot.slane %v1159_v39, 4 }
 0x1dd   : > { %v1293_v16 = vrot.slane %v1292_v9, 4  ;;  %v1318_v30 = vperm.slane %v1270_v14, %v3355_v21  ;;  %v1179_v32 = vrot.slane %v1178_v0, 4  ;;  %v1492_v35 = vsel %vm1487_vm3, %v1221_v22, 0 }
 0x1de   : > { %v1321_v27 = vrot.slane %v1313_v51, 4  ;;  %v1296_v29 = vsel %vm805_vm2, %v1292_v9, %v1295_v48  ;;  %v1224_v36 = vpack.i.b16 %v1223_v25, %v1222_v7  ;;  %1501 = vmatpush.bf16.xpose.msra.mxu1 %v1492_v35  ;;  %v1161_v39 = vsel %vm805_vm2, 0, %v1160_v26 }
 0x1df   : > { %v1294_v33 = vsel %vm805_vm2, %v1293_v16, %v1287_v4  ;;  %v1304_v34 = vperm.slane %v1296_v29, %v3363_v31  ;;  %v1319_v38 = vrot.slane %v1318_v30, 4  ;;  %v1180_v46 = vsel %vm805_vm2, 0, %v1179_v32 }
 0x1e0   : > { %v1300_v37 = vperm.slane %v1294_v33, %v3363_v31  ;;  %v1322_v42 = vsel %vm805_vm2, %v1318_v30, %v1321_v27  ;;  %v1511_v45 = vsel %vm1487_vm3, %v1224_v36, 0  ;;  %v1114_v50 = vsel %vm805_vm2, 0, %v1113_v8 }
 0x1e1   : > { %v1307_v44 = vrot.slane %v1304_v34, 4  ;;  %v1330_v13 = vperm.slane %v1322_v42, %v3363_v31  ;;  %v1320_v53 = vsel %vm805_vm2, %v1319_v38, %v1313_v51  ;;  %1520 = vmatpush.bf16.xpose.msra.mxu2 %v1511_v45  ;;  %v1227_v54 = vpack.i.b16 %v1180_v46, %v1161_v39 }
 0x1e2   : > { %v1305_v52 = vrot.slane %v1300_v37, 4  ;;  %v1139_v55 = vrot.slane %v3523_v1, 4  ;;  %v1326_v58 = vperm.slane %v1320_v53, %v3363_v31  ;;  %v1205_v61 = vrot.slane %v1142_v11, 4 }
 0x1e3   : > { %v1308_v57 = vsel %vm805_vm2, 0, %v1307_v44  ;;  %v1333_v60 = vrot.slane %v1330_v13, 4  ;;  %v1228_v0 = vshrl.u32 %v1161_v39, 16  ;;  %v1229_v2 = vshrl.u32 %v1180_v46, 16 }
 0x1e4   : > { %v1392_v62 = vrot.slane %v1308_v57, 4  ;;  %v1306_v4 = vsel %vm805_vm2, 0, %v1305_v52  ;;  %v1331_v6 = vrot.slane %v1326_v58, 4  ;;  %v1530_v8 = vsel %vm1487_vm3, %v1227_v54, 0 }
 0x1e5   : > { %v1334_v7 = vsel %vm805_vm2, 0, %v1333_v60  ;;  %1539 = vmatpush.bf16.xpose.msra.mxu3 %v1530_v8  ;;  %v1230_v51 = vpack.i.b16 %v1229_v2, %v1228_v0  ;;  %v948_v14 = vrot.slane %v947_v28, 4  ;;  %2637 = vmatmul.msk.bf16.vlgmr.msra.gmra.mxu1 %vm1487_vm3, %v977_v12  ;;  %v1140_v11 = vsel %vm805_vm2, 0, %v1139_v55 }
 0x1e6   : > { %v1393_v9 = vsel %vm805_vm2, %v1392_v62, %v1306_v4  ;;  %v1411_v48 = vrot.slane %v1334_v7, 4  ;;  %v1181_v16 = vsel %vm805_vm2, %v3509_v49, %v3507_v47  ;;  %v1187_v22 = vsel %vm805_vm2, %v1186_v3, %v1114_v50 }
 0x1e7   : > { %v3564_v25 = vperm.slane %v3501_v41, %v3363_v31  ;;  %v1387_v59 = vsel %vm805_vm2, %v1307_v44, %v1300_v37  ;;  %v1406_v28 = vsel %vm805_vm2, %v1333_v60, %v1326_v58  ;;  %v1549_v5 = vsel %vm1487_vm3, %v1230_v51, 0 }
 0x1e8   : > { %v1191_v10 = vperm.slane %v1187_v22, %v3355_v21  ;;  %v1332_v12 = vsel %vm805_vm2, 0, %v1331_v6  ;;  %1558 = vmatpush.bf16.xpose.msrb.mxu0 %v1549_v5  ;;  %2638 = vmatmul.msk.bf16.vlgmr.msra.gmra.mxu2 %vm1487_vm3, %v3419_v17  ;;  %v1200_v47 = vsel %vm805_vm2, %v3517_v63, %v3523_v1  ;;  %v1206_v41 = vsel %vm805_vm2, %v1205_v61, %v1140_v11 }
 0x1e9   : > { %v1397_v49 = vperm.slane %v1393_v9, %v3355_v21  ;;  %v1185_v3 = vperm.slane %v1181_v16, %v3355_v21  ;;  %v1210_v27 = vperm.slane %v1206_v41, %v3355_v21  ;;  %v1412_v29 = vsel %vm805_vm2, %v1411_v48, %v1332_v12 }
 0x1ea   : > { %v1192_v26 = vrot.slane %v1191_v10, 4  ;;  %v1391_v30 = vperm.slane %v1387_v59, %v3355_v21  ;;  %v949_v17 = vsel %vm805_vm2, %v948_v14, %v941_v56  ;;  %v1416_v63 = vperm.slane %v1412_v29, %v3355_v21 }
 0x1eb   : > { %v1398_v32 = vrot.slane %v1397_v49, 4  ;;  %v1204_v33 = vperm.slane %v1200_v47, %v3355_v21  ;;  %v1211_v34 = vrot.slane %v1210_v27, 4  ;;  %v1410_v23 = vperm.slane %v1406_v28, %v3355_v21 }
 0x1ec   : > { %v1193_v1 = vsel %vm805_vm2, %v1192_v26, %v1185_v3  ;;  %2639 = vmatmul.msk.bf16.vlgmr.msra.gmra.mxu3 %vm1487_vm3, %v983_v19  ;;  %v1417_v56 = vrot.slane %v1416_v63, 4  ;;  %v953_v38 = vperm.slane %v949_v17, %v3363_v31  ;;  %v973_v39 = vrot.slane %v3564_v25, 4 }
 0x1ed   : > { %v1197_v35 = vperm.slane %v1193_v1, %v3363_v31  ;;  %v1399_v36 = vsel %vm805_vm2, %v1398_v32, %v1391_v30  ;;  %v1212_v37 = vsel %vm805_vm2, %v1211_v34, %v1204_v33  ;;  %v991_v22 = vshrl.u32 %v3564_v25, 16 }
 0x1ee   : > { %v1403_v42 = vperm.slane %v1399_v36, %v3363_v31  ;;  %v1216_v44 = vperm.slane %v1212_v37, %v3363_v31  ;;  %v1418_v18 = vsel %vm805_vm2, %v1417_v56, %v1410_v23  ;;  %v954_v9 = vrot.slane %v953_v38, 4 }
 0x1ef   : > { %v1198_v15 = vrot.slane %v1197_v35, 4  ;;  %2640 = vmatmul.msk.bf16.vlgmr.msrb.gmra.mxu0 %vm1487_vm3, %v3428_v24  ;;  %v1234_v19 = vshrl.u32 %v1197_v35, 16  ;;  %v1422_v13 = vperm.slane %v1418_v18, %v3363_v31  ;;  %v974_v59 = vsel %vm805_vm2, 0, %v973_v39 }
 0x1f0   : > { %v1466_v45 = vshrl.u32 %v1403_v42, 16  ;;  %v1404_v46 = vrot.slane %v1403_v42, 4  ;;  %v1233_v50 = vpack.i.b16 %v1216_v44, %v1197_v35  ;;  %v1235_v52 = vshrl.u32 %v1216_v44, 16 }
 0x1f1   : > { %v1199_v53 = vsel %vm805_vm2, 0, %v1198_v15  ;;  %v1217_v54 = vrot.slane %v1216_v44, 4  ;;  %v1465_v57 = vpack.i.b16 %v1422_v13, %v1403_v42  ;;  %v1467_v58 = vshrl.u32 %v1422_v13, 16 }
 0x1f2   : > { %v1240_v55 = vshrl.u32 %v1199_v53, 16  ;;  %v1405_v60 = vsel %vm805_vm2, 0, %v1404_v46  ;;  %v1568_v61 = vsel %vm1487_vm3, %v1233_v50, 0  ;;  %v1236_v62 = vpack.i.b16 %v1235_v52, %v1234_v19 }
 0x1f3   : > { %v1218_v24 = vsel %vm805_vm2, 0, %v1217_v54  ;;  %v1423_v0 = vrot.slane %v1422_v13, 4  ;;  %1577 = vmatpush.bf16.xpose.msrb.mxu1 %v1568_v61  ;;  %v1741_v6 = vsel %vm1739_vm4, %v1465_v57, 0  ;;  %v1468_v7 = vpack.i.b16 %v1467_v58, %v1466_v45 }
 0x1f4   : > { %v1239_v2 = vpack.i.b16 %v1218_v24, %v1199_v53  ;;  %v1241_v4 = vshrl.u32 %v1218_v24, 16  ;;  %v1587_v8 = vsel %vm1487_vm3, %v1236_v62, 0  ;;  %v1472_v28 = vshrl.u32 %v1405_v60, 16 }
 0x1f5   : > { %v1424_v48 = vsel %vm805_vm2, 0, %v1423_v0  ;;  %1596 = vmatpush.bf16.xpose.msrb.mxu2 %v1587_v8  ;;  %v1760_v11 = vsel %vm1739_vm4, %v1468_v7, 0  ;;  %v989_v47 = vpack.i.b16 %v3564_v25, %v953_v38  ;;  %v990_v41 = vshrl.u32 %v953_v38, 16 }
 0x1f6   : > { %v1606_v51 = vsel %vm1487_vm3, %v1239_v2, 0  ;;  %v1242_v14 = vpack.i.b16 %v1241_v4, %v1240_v55  ;;  %v1471_v16 = vpack.i.b16 %v1424_v48, %v1405_v60  ;;  %v1473_v5 = vshrl.u32 %v1424_v48, 16  ;;  %v3639_v55 = vpop.permute.xlu1 %1245 }
 0x1f7   : > { %1615 = vmatpush.bf16.xpose.msrb.mxu3 %v1606_v51  ;;  %v955_v49 = vsel %vm805_vm2, 0, %v954_v9  ;;  %v997_v26 = vshrl.u32 %v974_v59, 16  ;;  %v992_v27 = vpack.i.b16 %v991_v22, %v990_v41 }
 0x1f8   : > { %v1625_v10 = vsel %vm1487_vm3, %v1242_v14, 0  ;;  %v1779_v12 = vsel %vm1739_vm4, %v1471_v16, 0  ;;  %v1474_v3 = vpack.i.b16 %v1473_v5, %v1472_v28  ;;  %v995_v30 = vpack.i.b16 %v974_v59, %v955_v49 }
 0x1f9   : > { %1634 = vmatpush.bf16.xpose.msra.mxu0 %v1625_v10  ;;  %v996_v17 = vshrl.u32 %v955_v49, 16 }
 0x1fa   : > { %2641 = vmatmul.msk.bf16.vlgmr.msrb.gmra.mxu1 %vm1487_vm3, %v989_v47  ;;  %v1798_v29 = vsel %vm1739_vm4, %v1474_v3, 0 }
 0x1fb   : > { %1750 = vmatpush.bf16.msra.mxu1 %v1741_v6  ;;  %v998_v32 = vpack.i.b16 %v997_v26, %v996_v17 }
 0x1fc   : > { %2642 = vmatmul.msk.bf16.vlgmr.msrb.gmra.mxu2 %vm1487_vm3, %v992_v27 }
 0x1fd   : > { %1769 = vmatpush.bf16.msra.mxu2 %v1760_v11 }
 0x1fe   : > { %2643 = vmatmul.msk.bf16.vlgmr.msrb.gmra.mxu3 %vm1487_vm3, %v995_v30 }
 0x1ff   : > { %1788 = vmatpush.bf16.msra.mxu3 %v1779_v12 }
 0x200   : > { %2644 = vmatmul.msk.bf16.vlgmr.msra.gmra.mxu0 %vm1487_vm3, %v998_v32 }
 0x201   : > { %1807 = vmatpush.bf16.msrb.mxu0 %v1798_v29 }
 0x262   : > { %v1503_v25 = vpop.f32.mrf.mxu1 }
 0x263   : > { %v1640_v63 = vsel %vm1487_vm3, %v1503_v25, -inf }
 0x264   : > { %1641 = vmax.xlane.f32.xlu1 %v1640_v63 }
 0x26a   : > { %v1505_v1 = vpop.f32.mrf.mxu1 }
 0x26b   : > { %v1522_v33 = vpop.f32.mrf.mxu2 }
 0x26c   : > { %v1560_v34 = vpop.f32.mrf.mxu0  ;;  %v1643_v35 = vsel %vm1487_vm3, %v1522_v33, -inf }
 0x26d   : > { %v1649_v36 = vsel %vm1487_vm3, %v1560_v34, -inf  ;;  %1644 = vmax.xlane.f32.xlu0 %v1643_v35 }
 0x26e   : > { %1650 = vmax.xlane.f32.xlu2 %v1649_v36 }
 0x26f   : > { %v1541_v23 = vpop.f32.mrf.mxu3 }
 0x270   : > { %v1646_v38 = vsel %vm1487_vm3, %v1541_v23, -inf }
 0x273   : > { %v1524_v56 = vpop.f32.mrf.mxu2 }
 0x274   : > { %v1562_v37 = vpop.f32.mrf.mxu0 }
 0x275   : > { %v1274_v37 = vshrl.u32 %v3639_v55, 16 }
 0x276   : > { %1647 = vmax.xlane.f32.xlu2 %v1646_v38 }
 0x277   : > { %v1579_v42 = vpop.f32.mrf.mxu1  ;;  %v1543_v39 = vpop.f32.mrf.mxu3 }
 0x278   : > { %v1652_v44 = vsel %vm1487_vm3, %v1579_v42, -inf }
 0x279   : > { %1653 = vmax.xlane.f32.xlu1 %v1652_v44 }
 0x27d   : > { %v1636_v15 = vpop.f32.mrf.mxu0 }
 0x27e   : > { %v1661_v18 = vsel %vm1487_vm3, %v1636_v15, -inf }
 0x27f   : > { %1662 = vmax.xlane.f32.xlu2 %v1661_v18  ;;  %v1581_v19 = vpop.f32.mrf.mxu1  ;;  %v1598_v13 = vpop.f32.mrf.mxu2 }
 0x280   : > { %v1655_v46 = vsel %vm1487_vm3, %v1598_v13, -inf }
 0x281   : > { %v1617_v45 = vpop.f32.mrf.mxu3  ;;  %1656 = vmax.xlane.f32.xlu0 %v1655_v46 }
 0x282   : > { %v1658_v52 = vsel %vm1487_vm3, %v1617_v45, -inf }
 0x285   : > { %v1638_v50 = vpop.f32.mrf.mxu0 }
 0x287   : > { %1659 = vmax.xlane.f32.xlu2 %v1658_v52  ;;  %v1600_v53 = vpop.f32.mrf.mxu2 }
 0x289   : > { %v1619_v54 = vpop.f32.mrf.mxu3 }
 0x292   : > { %1257 = vrot.lane.b32.xlu1 %v3370_v40, %s3091_s10 }
 0x295   : > { %1249 = vrot.lane.b32.xlu0 %v3373_v43, %s3091_s10 }
 0x29f   : > { %1253 = vrot.lane.b32.xlu2 %v3353_v20, %s3091_s10  ;;  %s3097_s10 = smov 128  }
 0x2d7   : > { %v1642_v57 = vpop.xlane.xlu1 %1641 }
 0x2d8   : > { %v1664_v58 = vsub.f32 %v1503_v25, %v1642_v57 }
 0x2da   : > { %v1672_v60 = vmul.f32 1.442695, %v1664_v58 }
 0x2dc   : > { %2826 = vpow2.f32 %v1672_v60 }
 0x2e0   : > { %v1645_v61 = vpop.xlane.xlu0 %1644 }
 0x2e1   : > { %v1651_v62 = vpop.xlane.xlu2 %1650  ;;  %v1665_v24 = vsub.f32 %v1522_v33, %v1645_v61 }
 0x2e2   : > { %v3641_v0 = vpop.eup %2826  ;;  %v1667_v6 = vsub.f32 %v1560_v34, %v1651_v62 }
 0x2e3   : > { %v1674_v2 = vmul.f32 1.442695, %v1665_v24  ;;  %v1688_v40 = vsel %vm1487_vm3, %v3641_v0, 0.0 }
 0x2e4   : > { %1689 = vadd.xlane.f32.xlu1 %v1688_v40  ;;  %v1678_v9 = vmul.f32 1.442695, %v1667_v6 }
 0x2e5   : > { %2828 = vpow2.f32 %v1674_v2 }
 0x2e9   : > { %v1648_v43 = vpop.xlane.xlu2 %1647 }
 0x2ea   : > { %v1666_v4 = vsub.f32 %v1541_v23, %v1648_v43 }
 0x2eb   : > { %v3645_v20 = vpop.eup %2828 }
 0x2ec   : > { %v1676_v7 = vmul.f32 1.442695, %v1666_v4  ;;  %v1691_v8 = vsel %vm1487_vm3, %v3645_v20, 0.0  ;;  %v1654_v48 = vpop.xlane.xlu1 %1653 }
 0x2ed   : > { %1692 = vadd.xlane.f32.xlu2 %v1691_v8  ;;  %v1668_v14 = vsub.f32 %v1579_v42, %v1654_v48 }
 0x2ee   : > { %2830 = vpow2.f32 %v1676_v7 }
 0x2ef   : > { %2832 = vpow2.f32 %v1678_v9  ;;  %v1680_v28 = vmul.f32 1.442695, %v1668_v14 }
 0x2f2   : > { %v1663_v51 = vpop.xlane.xlu2 %1662 }
 0x2f3   : > { %v1671_v41 = vsub.f32 %v1636_v15, %v1663_v51 }
 0x2f4   : > { %v3649_v11 = vpop.eup %2830  ;;  %v1657_v16 = vpop.xlane.xlu0 %1656 }
 0x2f5   : > { %v1669_v22 = vsub.f32 %v1598_v13, %v1657_v16  ;;  %v1694_v59 = vsel %vm1487_vm3, %v3649_v11, 0.0  ;;  %v3653_v12 = vpop.eup %2832  ;;  %v1686_v27 = vmul.f32 1.442695, %v1671_v41 }
 0x2f6   : > { %1695 = vadd.xlane.f32.xlu0 %v1694_v59  ;;  %v1697_v3 = vsel %vm1487_vm3, %v3653_v12, 0.0 }
 0x2f7   : > { %v1682_v5 = vmul.f32 1.442695, %v1669_v22 }
 0x2f9   : > { %2834 = vpow2.f32 %v1682_v5 }
 0x2fa   : > { %v1660_v10 = vpop.xlane.xlu2 %1659  ;;  %2836 = vpow2.f32 %v1680_v28 }
 0x2fb   : > { %v1670_v47 = vsub.f32 %v1617_v45, %v1660_v10 }
 0x2fd   : > { %v1684_v49 = vmul.f32 1.442695, %v1670_v47 }
 0x2fe   : > { %1698 = vadd.xlane.f32.xlu0 %v1697_v3 }
 0x2ff   : > { %2838 = vpow2.f32 %v1684_v49  ;;  %v3657_v26 = vpop.eup %2834 }
 0x300   : > { %v1703_v29 = vsel %vm1487_vm3, %v3657_v26, 0.0  ;;  %v3661_v30 = vpop.eup %2836  ;;  %2840 = vpow2.f32 %v1686_v27 }
 0x301   : > { %1704 = vadd.xlane.f32.xlu1 %v1703_v29  ;;  %v1700_v63 = vsel %vm1487_vm3, %v3661_v30, 0.0 }
 0x302   : > { %v1254_v17 = vpop.permute.xlu2 %1253 }
 0x303   : > { %v1280_v1 = vshrl.u32 %v1254_v17, 16 }
 0x304   : > { %v1258_v25 = vpop.permute.xlu1 %1257 }
 0x305   : > { %v3663_v32 = vpop.eup %2838  ;;  %v1279_v33 = vpack.i.b16 %v1258_v25, %v1254_v17  ;;  %v1281_v34 = vshrl.u32 %v1258_v25, 16 }
 0x306   : > { %v1706_v35 = vsel %vm1487_vm3, %v3663_v32, 0.0  ;;  %1701 = vadd.xlane.f32.xlu0 %v1700_v63  ;;  %v3673_v15 = vpop.eup %2840 }
 0x307   : > { %1707 = vadd.xlane.f32.xlu2 %v1706_v35  ;;  %v1282_v36 = vpack.i.b16 %v1281_v34, %v1280_v1  ;;  %v1344_v23 = vperm.slane %v1279_v33, %v3355_v21  ;;  %v1250_v56 = vpop.permute.xlu0 %1249  ;;  %v1709_v53 = vsel %vm1487_vm3, %v3673_v15, 0.0 }
 0x308   : > { %v1273_v38 = vpack.i.b16 %v1250_v56, %v3639_v55  ;;  %v1275_v42 = vshrl.u32 %v1250_v56, 16 }
 0x309   : > { %v1345_v39 = vrot.slane %v1344_v23, 4  ;;  %v1370_v44 = vperm.slane %v1282_v36, %v3355_v21 }
 0x30a   : > { %v1276_v18 = vpack.i.b16 %v1275_v42, %v1274_v37  ;;  %v1339_v19 = vperm.slane %v1273_v38, %v3355_v21 }
 0x30b   : > { %v1371_v13 = vrot.slane %v1370_v44, 4 }
 0x30c   : > { %v1346_v45 = vsel %vm805_vm2, %v1345_v39, %v1339_v19  ;;  %v1347_v46 = vrot.slane %v1339_v19, 4  ;;  %v1365_v50 = vperm.slane %v1276_v18, %v3355_v21 }
 0x30d   : > { %v1352_v52 = vperm.slane %v1346_v45, %v3363_v31 }
 0x30e   : > { %v1348_v54 = vsel %vm805_vm2, %v1344_v23, %v1347_v46  ;;  %v1372_v55 = vsel %vm805_vm2, %v1371_v13, %v1365_v50  ;;  %v1373_v57 = vrot.slane %v1365_v50, 4 }
 0x30f   : > { %1710 = vadd.xlane.f32.xlu2 %v1709_v53  ;;  %v1356_v58 = vperm.slane %v1348_v54, %v3363_v31  ;;  %v1378_v60 = vperm.slane %v1372_v55, %v3363_v31  ;;  %v1357_v62 = vrot.slane %v1352_v52, 4 }
 0x310   : > { %v1374_v61 = vsel %vm805_vm2, %v1370_v44, %v1373_v57 }
 0x311   : > { %v1359_v24 = vrot.slane %v1356_v58, 4  ;;  %v1382_v2 = vperm.slane %v1374_v61, %v3363_v31  ;;  %v1383_v43 = vrot.slane %v1378_v60, 4  ;;  %v1358_v7 = vsel %vm805_vm2, 0, %v1357_v62 }
 0x313   : > { %v1360_v40 = vsel %vm805_vm2, 0, %v1359_v24  ;;  %v1385_v4 = vrot.slane %v1382_v2, 4  ;;  %v1425_v9 = vsel %vm805_vm2, %v1359_v24, %v1352_v52  ;;  %v1384_v14 = vsel %vm805_vm2, 0, %v1383_v43 }
 0x314   : > { %v1430_v6 = vrot.slane %v1360_v40, 4  ;;  %v1429_v28 = vperm.slane %v1425_v9, %v3355_v21 }
 0x315   : > { %v1386_v8 = vsel %vm805_vm2, 0, %v1385_v4  ;;  %v1444_v22 = vsel %vm805_vm2, %v1385_v4, %v1378_v60 }
 0x316   : > { %v1431_v48 = vsel %vm805_vm2, %v1430_v6, %v1358_v7  ;;  %v1449_v51 = vrot.slane %v1386_v8, 4  ;;  %v1448_v41 = vperm.slane %v1444_v22, %v3355_v21 }
 0x317   : > { %v1435_v16 = vperm.slane %v1431_v48, %v3355_v21 }
 0x318   : > { %v1450_v59 = vsel %vm805_vm2, %v1449_v51, %v1384_v14 }
 0x319   : > { %v1436_v5 = vrot.slane %v1435_v16, 4  ;;  %v1454_v10 = vperm.slane %v1450_v59, %v3355_v21 }
 0x31b   : > { %v1437_v47 = vsel %vm805_vm2, %v1436_v5, %v1429_v28  ;;  %v1455_v49 = vrot.slane %v1454_v10, 4 }
 0x31c   : > { %v1441_v3 = vperm.slane %v1437_v47, %v3363_v31 }
 0x31d   : > { %v1456_v27 = vsel %vm805_vm2, %v1455_v49, %v1448_v41 }
 0x31e   : > { %v1460_v29 = vperm.slane %v1456_v27, %v3363_v31  ;;  %v1442_v17 = vrot.slane %v1441_v3, 4  ;;  %v1478_v25 = vshrl.u32 %v1441_v3, 16 }
 0x320   : > { %v1477_v63 = vpack.i.b16 %v1460_v29, %v1441_v3  ;;  %v1479_v1 = vshrl.u32 %v1460_v29, 16  ;;  %v1443_v33 = vsel %vm805_vm2, 0, %v1442_v17  ;;  %v1461_v34 = vrot.slane %v1460_v29, 4 }
 0x321   : > { %v1484_v37 = vshrl.u32 %v1443_v33, 16 }
 0x322   : > { %v1817_v35 = vsel %vm1739_vm4, %v1477_v63, 0  ;;  %v1480_v36 = vpack.i.b16 %v1479_v1, %v1478_v25  ;;  %v1462_v23 = vsel %vm805_vm2, 0, %v1461_v34 }
 0x323   : > { %1826 = vmatpush.bf16.msrb.mxu1 %v1817_v35  ;;  %v1483_v56 = vpack.i.b16 %v1462_v23, %v1443_v33  ;;  %v1485_v38 = vshrl.u32 %v1462_v23, 16 }
 0x324   : > { %v1836_v42 = vsel %vm1739_vm4, %v1480_v36, 0 }
 0x325   : > { %1845 = vmatpush.bf16.msrb.mxu2 %v1836_v42  ;;  %v1855_v39 = vsel %vm1739_vm4, %v1483_v56, 0  ;;  %v1486_v44 = vpack.i.b16 %v1485_v38, %v1484_v37 }
 0x326   : > { %1864 = vmatpush.bf16.msrb.mxu3 %v1855_v39 }
 0x327   : > { %v1874_v18 = vsel %vm1739_vm4, %v1486_v44, 0 }
 0x328   : > { %1883 = vmatpush.bf16.msra.mxu0 %v1874_v18 }
 0x357   : > { %v1690_v19 = vpop.xlane.xlu1 %1689 }
 0x358   : > { %2842 = vrcp.f32 %v1690_v19 }
 0x35e   : > { %v2843_v13 = vpop.eup %2842 }
 0x35f   : > { %v1720_v45 = vmul.f32 %v2843_v13, %v3641_v0 }
 0x360   : > { %v1693_v46 = vpop.xlane.xlu2 %1692 }
 0x361   : > { %2844 = vrcp.f32 %v1693_v46  ;;  %v1728_v50 = vpack.c.bf16 %v1720_v45, %v1720_v45 }
 0x363   : > { %2645 = vmatmul.msk.bf16.vlgmr.msra.gmra.mxu1 %vm1487_vm3, %v1728_v50 }
 0x367   : > { %v2845_v52 = vpop.eup %2844 }
 0x368   : > { %v1721_v53 = vmul.f32 %v2845_v52, %v3645_v20 }
 0x369   : > { %v1696_v54 = vpop.xlane.xlu0 %1695 }
 0x36a   : > { %v1729_v55 = vpack.c.bf16 %v1721_v53, %v1721_v53  ;;  %2846 = vrcp.f32 %v1696_v54 }
 0x36c   : > { %2646 = vmatmul.msk.bf16.vlgmr.msra.gmra.mxu2 %vm1487_vm3, %v1729_v55 }
 0x370   : > { %v2847_v57 = vpop.eup %2846 }
 0x371   : > { %v1722_v58 = vmul.f32 %v2847_v57, %v3649_v11  ;;  %v1699_v60 = vpop.xlane.xlu0 %1698 }
 0x372   : > { %2848 = vrcp.f32 %v1699_v60 }
 0x373   : > { %v1730_v61 = vpack.c.bf16 %v1722_v58, %v1722_v58 }
 0x374   : > { %v1705_v0 = vpop.xlane.xlu1 %1704 }
 0x375   : > { %2850 = vrcp.f32 %v1705_v0  ;;  %2647 = vmatmul.msk.bf16.vlgmr.msra.gmra.mxu3 %vm1487_vm3, %v1730_v61 }
 0x378   : > { %v2849_v62 = vpop.eup %2848 }
 0x379   : > { %v1723_v24 = vmul.f32 %v2849_v62, %v3653_v12  ;;  %v1702_v2 = vpop.xlane.xlu0 %1701 }
 0x37a   : > { %v1708_v20 = vpop.xlane.xlu2 %1707  ;;  %2852 = vrcp.f32 %v1702_v2 }
 0x37b   : > { %v2851_v40 = vpop.eup %2850  ;;  %v1731_v43 = vpack.c.bf16 %v1723_v24, %v1723_v24  ;;  %2854 = vrcp.f32 %v1708_v20 }
 0x37c   : > { %v1725_v4 = vmul.f32 %v2851_v40, %v3657_v26 }
 0x37d   : > { %2648 = vmatmul.msk.bf16.vlgmr.msrb.gmra.mxu0 %vm1487_vm3, %v1731_v43 }
 0x37e   : > { %v1733_v11 = vpack.c.bf16 %v1725_v4, %v1725_v4 }
 0x380   : > { %v2853_v6 = vpop.eup %2852  ;;  %2650 = vmatmul.msk.bf16.vlgmr.msrb.gmra.mxu2 %vm1487_vm3, %v1733_v11 }
 0x381   : > { %v2855_v7 = vpop.eup %2854  ;;  %v1724_v8 = vmul.f32 %v2853_v6, %v3661_v30 }
 0x382   : > { %v1711_v9 = vpop.xlane.xlu2 %1710  ;;  %v1726_v12 = vmul.f32 %v2855_v7, %v3663_v32 }
 0x383   : > { %2856 = vrcp.f32 %v1711_v9  ;;  %v1732_v48 = vpack.c.bf16 %v1724_v8, %v1724_v8 }
 0x384   : > { %v1734_v51 = vpack.c.bf16 %v1726_v12, %v1726_v12 }
 0x385   : > { %2649 = vmatmul.msk.bf16.vlgmr.msrb.gmra.mxu1 %vm1487_vm3, %v1732_v48 }
 0x386   : > { %2651 = vmatmul.msk.bf16.vlgmr.msrb.gmra.mxu3 %vm1487_vm3, %v1734_v51 }
 0x389   : > { %v2857_v26 = vpop.eup %2856 }
 0x38a   : > { %v1727_v14 = vmul.f32 %v2857_v26, %v3673_v15 }
 0x38c   : > { %v1735_v16 = vpack.c.bf16 %v1727_v14, %v1727_v14 }
 0x38e   : > { %2652 = vmatmul.msk.bf16.vlgmr.msra.gmra.mxu0 %vm1487_vm3, %v1735_v16 }
 0x3e0   : > { %v1752_v22 = vpop.f32.mrf.mxu1 }
 0x3e1   : > { %v1892_v30 = vrot.slane %v1752_v22, 4 }
 0x3e8   : > { %v1754_v59 = vpop.f32.mrf.mxu1 }
 0x3ef   : > { %v1771_v28 = vpop.f32.mrf.mxu2 }
 0x3f0   : > { %v1904_v32 = vrot.slane %v1771_v28, 4 }
 0x3f7   : > { %v1773_v5 = vpop.f32.mrf.mxu2 }
 0x3f8   : > { %v1790_v10 = vpop.f32.mrf.mxu3 }
 0x3f9   : > { %v1889_v47 = vrot.slane %v1790_v10, 4  ;;  %v1893_v41 = vsel %vm805_vm2, %v1790_v10, %v1892_v30 }
 0x3fa   : > { %v1901_v49 = vperm.slane %v1893_v41, %v3355_v21  ;;  %v1809_v3 = vpop.f32.mrf.mxu0 }
 0x3fb   : > { %v1891_v27 = vsel %vm805_vm2, %v1889_v47, %v1752_v22  ;;  %v1902_v29 = vrot.slane %v1809_v3, 4  ;;  %v1905_v15 = vsel %vm805_vm2, %v1809_v3, %v1904_v32 }
 0x3fc   : > { %v1897_v17 = vperm.slane %v1891_v27, %v3355_v21  ;;  %v1928_v25 = vrot.slane %v1901_v49, 4  ;;  %v1913_v63 = vperm.slane %v1905_v15, %v3355_v21 }
 0x3fd   : > { %v1903_v1 = vsel %vm805_vm2, %v1902_v29, %v1771_v28 }
 0x3fe   : > { %v1916_v33 = vrot.slane %v1897_v17, 4  ;;  %v1909_v34 = vperm.slane %v1903_v1, %v3355_v21  ;;  %v1926_v35 = vrot.slane %v1913_v63, 4  ;;  %v1929_v36 = vsel %vm805_vm2, %v1913_v63, %v1928_v25 }
 0x3ff   : > { %v1937_v23 = vperm.slane %v1929_v36, %v3363_v31 }
 0x400   : > { %v1914_v56 = vrot.slane %v1909_v34, 4  ;;  %v1917_v37 = vsel %vm805_vm2, %v1909_v34, %v1916_v33  ;;  %v1927_v38 = vsel %vm805_vm2, %v1926_v35, %v1901_v49  ;;  %v1792_v42 = vpop.f32.mrf.mxu3 }
 0x401   : > { %v1925_v39 = vperm.slane %v1917_v37, %v3363_v31  ;;  %v1933_v44 = vperm.slane %v1927_v38, %v3363_v31  ;;  %v1944_v18 = vrot.slane %v1937_v23, 4 }
 0x402   : > { %v1915_v19 = vsel %vm805_vm2, %v1914_v56, %v1897_v17  ;;  %v1811_v13 = vpop.f32.mrf.mxu0  ;;  %v1828_v45 = vpop.f32.mrf.mxu1 }
 0x403   : > { %v1921_v46 = vperm.slane %v1915_v19, %v3363_v31  ;;  %v1940_v50 = vrot.slane %v1925_v39, 4  ;;  %v1942_v52 = vrot.slane %v1933_v44, 4  ;;  %v1945_v53 = vsel %vm805_vm2, 0.0, %v1944_v18  ;;  %v1847_v54 = vpop.f32.mrf.mxu2 }
 0x404   : > { %v2018_v55 = vrot.slane %v1945_v53, 4  ;;  %v2013_v61 = vsel %vm805_vm2, %v1944_v18, %v1933_v44  ;;  %v1948_v40 = vrot.slane %v1828_v45, 4  ;;  %v1960_v11 = vrot.slane %v1847_v54, 4 }
 0x405   : > { %v1938_v57 = vrot.slane %v1921_v46, 4  ;;  %v1941_v58 = vsel %vm805_vm2, 0.0, %v1940_v50  ;;  %v1943_v60 = vsel %vm805_vm2, 0.0, %v1942_v52  ;;  %v2017_v20 = vperm.slane %v2013_v61, %v3355_v21 }
 0x406   : > { %v2007_v0 = vrot.slane %v1941_v58, 4  ;;  %v2019_v62 = vsel %vm805_vm2, %v2018_v55, %v1943_v60  ;;  %v2002_v4 = vsel %vm805_vm2, %v1940_v50, %v1921_v46 }
 0x407   : > { %v2023_v24 = vperm.slane %v2019_v62, %v3355_v21  ;;  %v1939_v2 = vsel %vm805_vm2, 0.0, %v1938_v57  ;;  %v2038_v59 = vrot.slane %v2017_v20, 4  ;;  %v2006_v5 = vperm.slane %v2002_v4, %v3355_v21 }
 0x408   : > { %v2008_v43 = vsel %vm805_vm2, %v2007_v0, %v1939_v2 }
 0x409   : > { %v1866_v6 = vpop.f32.mrf.mxu3  ;;  %v2012_v7 = vperm.slane %v2008_v43, %v3355_v21  ;;  %v2036_v22 = vrot.slane %v2023_v24, 4  ;;  %v2039_v33 = vsel %vm805_vm2, %v2023_v24, %v2038_v59  ;;  %v2026_v23 = vrot.slane %v2006_v5, 4 }
 0x40a   : > { %v1946_v8 = vrot.slane %v1866_v6, 4  ;;  %v1949_v9 = vsel %vm805_vm2, %v1866_v6, %v1948_v40  ;;  %v1830_v12 = vpop.f32.mrf.mxu1  ;;  %v2047_v13 = vperm.slane %v2039_v33, %v3363_v31  ;;  %v2698_v33 = vld [vmem:[%s3312_s12] sm:$0xff] }
 0x40b   : > { %v1885_v48 = vpop.f32.mrf.mxu0  ;;  %v1957_v51 = vperm.slane %v1949_v9, %v3355_v21  ;;  %v1849_v16 = vpop.f32.mrf.mxu2  ;;  %v2024_v41 = vrot.slane %v2012_v7, 4  ;;  %v2037_v17 = vsel %vm805_vm2, %v2036_v22, %v2017_v20  ;;  %v2027_v61 = vsel %vm805_vm2, %v2012_v7, %v2026_v23 }
 0x40c   : > { %v1958_v26 = vrot.slane %v1885_v48, 4  ;;  %v1961_v14 = vsel %vm805_vm2, %v1885_v48, %v1960_v11  ;;  %v1947_v28 = vsel %vm805_vm2, %v1946_v8, %v1828_v45  ;;  %v2043_v44 = vperm.slane %v2037_v17, %v3363_v31 }
 0x40d   : > { %v1969_v30 = vperm.slane %v1961_v14, %v3355_v21  ;;  %v1953_v10 = vperm.slane %v1947_v28, %v3355_v21  ;;  %v1984_v32 = vrot.slane %v1957_v51, 4  ;;  %v2025_v15 = vsel %vm805_vm2, %v2024_v41, %v2006_v5 }
 0x40e   : > { %v1959_v47 = vsel %vm805_vm2, %v1958_v26, %v1847_v54  ;;  %v2031_v56 = vperm.slane %v2025_v15, %v3363_v31  ;;  %v2048_v52 = vrot.slane %v2043_v44, 4  ;;  %v2035_v4 = vperm.slane %v2027_v61, %v3363_v31 }
 0x40f   : > { %v1965_v49 = vperm.slane %v1959_v47, %v3355_v21  ;;  %v1982_v3 = vrot.slane %v1969_v30, 4  ;;  %v1972_v27 = vrot.slane %v1953_v10, 4  ;;  %v1985_v29 = vsel %vm805_vm2, %v1969_v30, %v1984_v32 }
 0x410   : > { %v1993_v1 = vperm.slane %v1985_v29, %v3363_v31  ;;  %v2049_v0 = vsel %vm805_vm2, %v2048_v52, %v2031_v56  ;;  %v2052_v11 = vrot.slane %v2047_v13, 4  ;;  %v2054_v59 = vrot.slane %v2035_v4, 4  ;;  %v2819_v52 = vld [vmem:[%s3939_s27] ss:$0 sm:$0xff] }
 0x411   : > { %v1970_v25 = vrot.slane %v1965_v49, 4  ;;  %v1983_v63 = vsel %vm805_vm2, %v1982_v3, %v1957_v51  ;;  %v1973_v34 = vsel %vm805_vm2, %v1965_v49, %v1972_v27  ;;  %v1868_v36 = vpop.f32.mrf.mxu3 }
 0x412   : > { %v1989_v35 = vperm.slane %v1983_v63, %v3363_v31  ;;  %v1981_v38 = vperm.slane %v1973_v34, %v3363_v31  ;;  %v2000_v42 = vrot.slane %v1993_v1, 4  ;;  %v2053_v30 = vsel %vm805_vm2, %v2052_v11, %v2035_v4  ;;  %v2699_v1 = vld [vmem:[%s3312_s12 + $0x8] sm:$0xff] }
 0x413   : > { %v1971_v37 = vsel %vm805_vm2, %v1970_v25, %v1953_v10  ;;  %v1887_v39 = vpop.f32.mrf.mxu0  ;;  %v2055_v3 = vsel %vm805_vm2, %v2047_v13, %v2054_v59  ;;  %2172 = vmatpush.bf16.msra.mxu1 %v2699_v1 }
 0x414   : > { %v1977_v18 = vperm.slane %v1971_v37, %v3363_v31  ;;  %v1998_v19 = vrot.slane %v1989_v35, 4  ;;  %v1996_v45 = vrot.slane %v1981_v38, 4  ;;  %v2001_v46 = vsel %vm805_vm2, 0.0, %v2000_v42 }
 0x415   : > { %v2067_v50 = vsel %vm805_vm2, %v2000_v42, %v1989_v35  ;;  %v2072_v57 = vrot.slane %v2001_v46, 4 }
 0x416   : > { %v1994_v53 = vrot.slane %v1977_v18, 4  ;;  %v1999_v54 = vsel %vm805_vm2, 0.0, %v1998_v19  ;;  %v2071_v55 = vperm.slane %v2067_v50, %v3355_v21  ;;  %v1997_v58 = vsel %vm805_vm2, 0.0, %v1996_v45 }
 0x417   : > { %v2056_v60 = vsel %vm805_vm2, %v1996_v45, %v1977_v18  ;;  %v2061_v62 = vrot.slane %v1997_v58, 4  ;;  %v2073_v24 = vsel %vm805_vm2, %v2072_v57, %v1999_v54  ;;  %2173 = vmatpush.bf16.msra.mxu1 %v2698_v33 }
 0x418   : > { %v2092_v2 = vrot.slane %v2071_v55, 4  ;;  %v1995_v20 = vsel %vm805_vm2, 0.0, %v1994_v53  ;;  %v2077_v40 = vperm.slane %v2073_v24, %v3355_v21  ;;  %v2060_v43 = vperm.slane %v2056_v60, %v3355_v21 }
 0x419   : > { %v2062_v6 = vsel %vm805_vm2, %v2061_v62, %v1995_v20 }
 0x41a   : > { %v2066_v8 = vperm.slane %v2062_v6, %v3355_v21  ;;  %v2080_v7 = vrot.slane %v2060_v43, 4  ;;  %v2093_v9 = vsel %vm805_vm2, %v2077_v40, %v2092_v2  ;;  %v2090_v12 = vrot.slane %v2077_v40, 4 }
 0x41b   : > { %v2101_v48 = vperm.slane %v2093_v9, %v3363_v31  ;;  %v2050_v21 = vrot.slane %v2031_v56, 4  ;;  %v3095_v2 = vmov 32.0  }
 0x41c   : > { %v2081_v51 = vsel %vm805_vm2, %v2066_v8, %v2080_v7  ;;  %v2078_v26 = vrot.slane %v2066_v8, 4  ;;  %v2091_v14 = vsel %vm805_vm2, %v2090_v12, %v2071_v55  ;;  %v2868_v55 = vld [vmem:[#allocation10] sm:$0xff]  ;;  %2858 = vrcp.f32 %v3095_v2 }
 0x41d   : > { %v2089_v16 = vperm.slane %v2081_v51, %v3363_v31  ;;  %v2106_v22 = vrot.slane %v2101_v48, 4  ;;  %v2097_v28 = vperm.slane %v2091_v14, %v3363_v31  ;;  %v2051_v25 = vsel %vm805_vm2, %v2043_v44, %v2050_v21  ;;  %v2701_v21 = vld [vmem:[%s3317_s0 + $0x8] sm:$0xff] }
 0x41e   : > { %v2079_v5 = vsel %vm805_vm2, %v2078_v26, %v2060_v43  ;;  %2275 = vmatpush.bf16.msra.mxu2 %v2701_v21 }
 0x41f   : > { %v2107_v10 = vsel %vm805_vm2, %v2106_v22, %v2089_v16  ;;  %v2108_v32 = vrot.slane %v2089_v16, 4  ;;  %v2085_v47 = vperm.slane %v2079_v5, %v3363_v31  ;;  %v2102_v41 = vrot.slane %v2097_v28, 4  ;;  %v2700_v5 = vld [vmem:[%s3317_s0] sm:$0xff]  ;;  %s3940_s0 = scalar_lea.vmem [#allocation7], %s3283_s2 }
 0x420   : > { %v2808_v49 = vpack.i.bf16 %v2107_v10, %v2053_v30 }
 0x421   : > { %v2109_v27 = vsel %vm805_vm2, %v2101_v48, %v2108_v32  ;;  %v2104_v29 = vrot.slane %v2085_v47, 4  ;;  %v2103_v15 = vsel %vm805_vm2, %v2102_v41, %v2085_v47 }
 0x422   : > { %2809 = vrot.lane.b32.xlu0 %v2808_v49, %s3092_s7  ;;  %v2813_v17 = vpack.i.bf16 %v2109_v27, %v2055_v3  ;;  %v2859_v20 = vpop.eup %2858  ;;  %2276 = vmatpush.bf16.msra.mxu2 %v2700_v5 }
 0x423   : > { %v2105_v63 = vsel %vm805_vm2, %v2097_v28, %v2104_v29  ;;  %v2191_v40 = vmul.f32 32.0, %v2859_v20  ;;  %vm2195_vm7 = vweird.f32 %v2859_v20 }
 0x424   : > { %2814 = vrot.lane.b32.xlu2 %v2813_v17, %s3093_s22  ;;  %v2803_v31 = vpack.i.bf16 %v2105_v63, %v2051_v25 }
 0x425   : > { %v2192_v43 = vsub.f32 1.0, %v2191_v40 }
 0x426   : > { %2804 = vrot.lane.b32.xlu1 %v2803_v31, %s3094_s25 }
 0x427   : > { %v2193_v4 = vmul.f32 %v2859_v20, %v2192_v43 }
 0x429   : > { %v2194_v11 = vadd.f32 %v2859_v20, %v2193_v4 }
 0x42b   : > { %v3818_v6 = vsel %vm2195_vm7, %v2859_v20, %v2194_v11 }
 0x47e   : > { %v2815_v35 = vpop.permute.xlu2 %2814 }
 0x47f   : > { %v2817_v42 = vunpack.i.h.bf16 %v2815_v35  ;;  %v2816_v39 = vunpack.i.l.bf16 %v2815_v35 }
 0x494   : > { %v2810_v34 = vpop.permute.xlu0 %2809 }
 0x495   : > { %v2812_v37 = vunpack.i.h.bf16 %v2810_v34  ;;  %v2811_v38 = vunpack.i.l.bf16 %v2810_v34  ;;  %v2820_v34 = vld [vmem:[%s3940_s0] ss:$0 sm:$0xff] }
 0x498   : > { %v2805_v36 = vpop.permute.xlu1 %2804 }
 0x499   : > { %v2807_v23 = vunpack.i.h.bf16 %v2805_v36  ;;  %v2806_v56 = vunpack.i.l.bf16 %v2805_v36 }
 0x49b   : > { %v2134_v44 = vsel %vm1487_vm3, %v2049_v0, %v2806_v56  ;;  %v2135_v18 = vsel %vm1487_vm3, %v2103_v15, %v2807_v23  ;;  %v2869_v0 = vld [vmem:[#allocation10 + $0x8] sm:$0xff] }
 0x49c   : > { %v2137_v19 = vsel %vm2136_vm5, %v2134_v44, %v2811_v38  ;;  %v2138_v13 = vsel %vm2136_vm5, %v2135_v18, %v2812_v37  ;;  %v2821_v56 = vld [vmem:[%s698_s18] ss:$0 sm:$0xff] }
 0x49d   : > { %v2140_v45 = vsel %vm2139_vm6, %v2137_v19, %v2816_v39  ;;  %v2141_v46 = vsel %vm2139_vm6, %v2138_v13, %v2817_v42  ;;  %v2705_v19 = vld [vmem:[%s3331_s16 + $0x18] sm:$0xff]  ;;  %v2704_v13 = vld [vmem:[%s3331_s16 + $0x10] sm:$0xff] }
 0x49e   : > { %v2142_v50 = vpack.c.bf16 %v2141_v46, %v2140_v45  ;;  %2330 = vmatpush.bf16.msra.mxu3 %v2705_v19  ;;  %v2703_v45 = vld [vmem:[%s3331_s16 + $0x8] sm:$0xff]  ;;  %v2702_v46 = vld [vmem:[%s3331_s16] sm:$0xff] }
 0x4a0   : > { %2661 = vmatmul.msk.bf16.vlgmr.msra.gmra.mxu1 %vm736_vm1, %v2142_v50 }
 0x4a2   : > { %2331 = vmatpush.bf16.msra.mxu3 %v2704_v13 }
 0x4a6   : > { %2332 = vmatpush.bf16.msra.mxu3 %v2703_v45 }
 0x4aa   : > { %2333 = vmatpush.bf16.msra.mxu3 %v2702_v46 }
 0x51d   : > { %v2175_v53 = vpop.f32.mrf.mxu1 }
 0x51e   : > { %v2176_v54 = vadd.f32 %v2819_v52, %v2175_v53 }
 0x520   : > { %v2180_v57 = vadd.f32 %v2868_v55, %v2176_v54 }
 0x522   : > { %v2184_v58 = vsel %vm736_vm1, %v2180_v57, 0.0 }
 0x523   : > { %2185 = vadd.xlane.f32.xlu0 %v2184_v58 }
 0x525   : > { %v2177_v60 = vpop.f32.mrf.mxu1 }
 0x526   : > { %v2178_v61 = vadd.f32 %v2819_v52, %v2177_v60  ;;  %v2822_v52 = vld [vmem:[%s687_s30] ss:$0 sm:$0xff]  ;;  %s3943_s30 = scalar_lea.vmem [#allocation8], %s3283_s2  ;;  %s3096_s2 = smov [#allocation10]  }
 0x527   : > { %s2408_s5 = sshll.u32 %s3096_s2, 4  ;;  %s2409_s5 = int_to_ptr.vmem [resolvable:$true] %s2408_s5 }
 0x528   : > { %v2181_v62 = vadd.f32 %v2869_v0, %v2178_v61  ;;  %v2823_v61 = vld [vmem:[%s695_s23] ss:$0 sm:$0xff] }
 0x52a   : > { %v2187_v24 = vsel %vm736_vm1, %v2181_v62, 0.0 }
 0x52b   : > { %2188 = vadd.xlane.f32.xlu1 %v2187_v24 }
 0x596   : > { %v2186_v8 = vpop.xlane.xlu0 %2185 }
 0x597   : > { %v2197_v7 = vmul.f32 %v3818_v6, %v2186_v8 }
 0x599   : > { %v2199_v9 = vsub.f32 %v2180_v57, %v2197_v7 }
 0x59b   : > { %v2201_v12 = vmul.f32 %v2199_v9, %v2199_v9 }
 0x59d   : > { %v2203_v48 = vsel %vm736_vm1, %v2201_v12, 0.0 }
 0x59e   : > { %v2189_v51 = vpop.xlane.xlu1 %2188  ;;  %2204 = vadd.xlane.f32.xlu2 %v2203_v48 }
 0x59f   : > { %v2198_v26 = vmul.f32 %v3818_v6, %v2189_v51 }
 0x5a1   : > { %v2200_v14 = vsub.f32 %v2181_v62, %v2198_v26 }
 0x5a3   : > { %v2202_v16 = vmul.f32 %v2200_v14, %v2200_v14 }
 0x5a5   : > { %v2206_v22 = vsel %vm736_vm1, %v2202_v16, 0.0 }
 0x5a6   : > { %2207 = vadd.xlane.f32.xlu0 %v2206_v22 }
 0x611   : > { %v2205_v59 = vpop.xlane.xlu2 %2204 }
 0x612   : > { %v2209_v28 = vmul.f32 %v2205_v59, %v3818_v6 }
 0x614   : > { %v2211_v30 = vadd.f32 1e-05, %v2209_v28 }
 0x616   : > { %2860 = vrsqrt.f32 %v2211_v30  ;;  %vm2219_vm9 = vweird.f32 %v2211_v30 }
 0x619   : > { %v2208_v10 = vpop.xlane.xlu0 %2207 }
 0x61a   : > { %v2210_v32 = vmul.f32 %v2208_v10, %v3818_v6 }
 0x61c   : > { %v2861_v47 = vpop.eup %2860  ;;  %v2212_v41 = vadd.f32 1e-05, %v2210_v32 }
 0x61d   : > { %v2214_v49 = vmul.f32 %v2861_v47, %v2211_v30  ;;  %vm2220_vm8 = vweird.f32 %v2861_v47 }
 0x61e   : > { %2862 = vrsqrt.f32 %v2212_v41  ;;  %vm2221_vm10 = vmor %vm2219_vm9, %vm2220_vm8  ;;  %vm2229_vm12 = vweird.f32 %v2212_v41 }
 0x61f   : > { %v2215_v3 = vmul.f32 %v2861_v47, %v2214_v49 }
 0x621   : > { %v2216_v27 = vmul.f32 0.5, %v2215_v3 }
 0x623   : > { %v2217_v29 = vsub.f32 1.5, %v2216_v27 }
 0x624   : > { %v2863_v15 = vpop.eup %2862 }
 0x625   : > { %v2218_v17 = vmul.f32 %v2861_v47, %v2217_v29  ;;  %v2224_v25 = vmul.f32 %v2863_v15, %v2212_v41  ;;  %vm2230_vm11 = vweird.f32 %v2863_v15 }
 0x626   : > { %vm2231_vm13 = vmor %vm2229_vm12, %vm2230_vm11 }
 0x627   : > { %v2225_v63 = vmul.f32 %v2863_v15, %v2224_v25  ;;  %v2222_v31 = vsel %vm2221_vm10, %v2861_v47, %v2218_v17 }
 0x628   : > { %v2233_v35 = vmul.f32 %v2222_v31, %v2199_v9 }
 0x629   : > { %v2226_v1 = vmul.f32 0.5, %v2225_v63 }
 0x62a   : > { %v2238_v37 = vmul.f32 %v2820_v34, %v2233_v35 }
 0x62b   : > { %v2227_v33 = vsub.f32 1.5, %v2226_v1 }
 0x62c   : > { %v2243_v39 = vadd.f32 %v2821_v56, %v2238_v37 }
 0x62d   : > { %v2228_v36 = vmul.f32 %v2863_v15, %v2227_v33 }
 0x62f   : > { %v2232_v23 = vsel %vm2231_vm13, %v2863_v15, %v2228_v36  ;;  %v2824_v15 = vld [vmem:[%s3943_s30] ss:$0 sm:$0xff] }
 0x630   : > { %v2234_v38 = vmul.f32 %v2232_v23, %v2200_v14 }
 0x632   : > { %v2239_v42 = vmul.f32 %v2820_v34, %v2234_v38 }
 0x634   : > { %v2244_v44 = vadd.f32 %v2821_v56, %v2239_v42 }
 0x636   : > { %v2245_v18 = vpack.c.bf16 %v2244_v44, %v2243_v39 }
 0x638   : > { %2670 = vmatmul.msk.bf16.vlgmr.msra.gmra.mxu2 %vm736_vm1, %v2245_v18 }
 0x6bb   : > { %v2278_v50 = vpop.f32.mrf.mxu2 }
 0x6bc   : > { %v2279_v53 = vadd.f32 %v2822_v52, %v2278_v50 }
 0x6be   : > { %v2283_v57 = vmax.f32 %v2279_v53, 0.0 }
 0x6c3   : > { %v2280_v54 = vpop.f32.mrf.mxu2 }
 0x6c4   : > { %v2281_v55 = vadd.f32 %v2822_v52, %v2280_v54 }
 0x6c6   : > { %v2284_v58 = vmax.f32 %v2281_v55, 0.0 }
 0x6c8   : > { %v2285_v60 = vpack.c.bf16 %v2284_v58, %v2283_v57 }
 0x6ca   : > { %2687 = vmatmul.msk.bf16.vlgmr.msra.gmra.mxu3 %vm2322_vm14, %v2285_v60 }
 0x74d   : > { %v2335_v0 = vpop.f32.mrf.mxu3 }
 0x74e   : > { %v2336_v62 = vadd.f32 %v2823_v61, %v2335_v0 }
 0x750   : > { %v2340_v24 = vadd.f32 %v2336_v62, %v2243_v39 }
 0x752   : > { %v2344_v2 = vsel %vm736_vm1, %v2340_v24, 0.0 }
 0x753   : > { %2345 = vadd.xlane.f32.xlu1 %v2344_v2 }
 0x755   : > { %v2337_v20 = vpop.f32.mrf.mxu3 }
 0x756   : > { %v2338_v40 = vadd.f32 %v2823_v61, %v2337_v20 }
 0x758   : > { %v2341_v43 = vadd.f32 %v2338_v40, %v2244_v44 }
 0x75a   : > { %v2347_v4 = vsel %vm736_vm1, %v2341_v43, 0.0 }
 0x75b   : > { %2348 = vadd.xlane.f32.xlu2 %v2347_v4 }
 0x7c6   : > { %v2346_v11 = vpop.xlane.xlu1 %2345 }
 0x7c7   : > { %v2350_v8 = vmul.f32 %v2346_v11, %v3818_v6 }
 0x7c9   : > { %v2352_v7 = vsub.f32 %v2340_v24, %v2350_v8 }
 0x7cb   : > { %v2354_v9 = vmul.f32 %v2352_v7, %v2352_v7 }
 0x7cd   : > { %v2356_v12 = vsel %vm736_vm1, %v2354_v9, 0.0 }
 0x7ce   : > { %v2349_v48 = vpop.xlane.xlu2 %2348  ;;  %2357 = vadd.xlane.f32.xlu0 %v2356_v12 }
 0x7cf   : > { %v2351_v51 = vmul.f32 %v2349_v48, %v3818_v6 }
 0x7d1   : > { %v2353_v26 = vsub.f32 %v2341_v43, %v2351_v51 }
 0x7d3   : > { %v2355_v14 = vmul.f32 %v2353_v26, %v2353_v26 }
 0x7d5   : > { %v2359_v16 = vsel %vm736_vm1, %v2355_v14, 0.0 }
 0x7d6   : > { %2360 = vadd.xlane.f32.xlu1 %v2359_v16 }
 0x841   : > { %v2358_v22 = vpop.xlane.xlu0 %2357 }
 0x842   : > { %v2362_v59 = vmul.f32 %v2358_v22, %v3818_v6 }
 0x844   : > { %v2364_v28 = vadd.f32 1e-05, %v2362_v59 }
 0x846   : > { %2864 = vrsqrt.f32 %v2364_v28  ;;  %vm2372_vm0 = vweird.f32 %v2364_v28 }
 0x849   : > { %v2361_v30 = vpop.xlane.xlu1 %2360 }
 0x84a   : > { %v2363_v21 = vmul.f32 %v2361_v30, %v3818_v6  ;;  %v2825_v6 = vld [vmem:[%s701_s11] ss:$0 sm:$0xff]  ;;  %s2410_s11 = sshll.u32 %s3945_s19, 4  ;;  %s2411_s11 = int_to_ptr.hbm [resolvable:$true] %s2410_s11 }
 0x84c   : > { %v2865_v5 = vpop.eup %2864  ;;  %v2365_v10 = vadd.f32 1e-05, %v2363_v21 }
 0x84d   : > { %v2367_v32 = vmul.f32 %v2865_v5, %v2364_v28  ;;  %vm2373_vm15 = vweird.f32 %v2865_v5 }
 0x84e   : > { %2866 = vrsqrt.f32 %v2365_v10  ;;  %vm2374_vm2 = vmor %vm2372_vm0, %vm2373_vm15  ;;  %vm2382_vm4 = vweird.f32 %v2365_v10 }
 0x84f   : > { %v2368_v47 = vmul.f32 %v2865_v5, %v2367_v32 }
 0x851   : > { %v2369_v41 = vmul.f32 0.5, %v2368_v47 }
 0x853   : > { %v2370_v49 = vsub.f32 1.5, %v2369_v41 }
 0x854   : > { %v2867_v3 = vpop.eup %2866 }
 0x855   : > { %v2371_v27 = vmul.f32 %v2865_v5, %v2370_v49  ;;  %v2377_v29 = vmul.f32 %v2867_v3, %v2365_v10  ;;  %vm2383_vm3 = vweird.f32 %v2867_v3 }
 0x856   : > { %vm2384_vm5 = vmor %vm2382_vm4, %vm2383_vm3 }
 0x857   : > { %v2375_v17 = vsel %vm2374_vm2, %v2865_v5, %v2371_v27  ;;  %v2378_v25 = vmul.f32 %v2867_v3, %v2377_v29 }
 0x858   : > { %v2386_v63 = vmul.f32 %v2375_v17, %v2352_v7 }
 0x859   : > { %v2379_v31 = vmul.f32 0.5, %v2378_v25 }
 0x85a   : > { %v2391_v1 = vmul.f32 %v2824_v15, %v2386_v63 }
 0x85b   : > { %v2380_v33 = vsub.f32 1.5, %v2379_v31 }
 0x85c   : > { %v2396_v34 = vadd.f32 %v2825_v6, %v2391_v1 }
 0x85d   : > { %v2381_v35 = vmul.f32 %v2867_v3, %v2380_v33 }
 0x85e   : > { %2398 = vst.msk [vmem:[#allocation10] sm:$0xff] %vm736_vm1, %v2396_v34 }
 0x85f   : > { %v2385_v36 = vsel %vm2384_vm5, %v2867_v3, %v2381_v35 }
 0x860   : > { %v2387_v23 = vmul.f32 %v2385_v36, %v2353_v26 }
 0x862   : > { %v2392_v56 = vmul.f32 %v2824_v15, %v2387_v23 }
 0x864   : > { %v2397_v37 = vadd.f32 %v2825_v6, %v2392_v56 }
 0x866   : > { %2399 = vst.msk [vmem:[#allocation10 + $0x8] sm:$0xff] %vm736_vm1, %v2397_v37 }
 0x867   : > { %2717 = dma.vmem_to_hbm [thread:$0]  (%p2737_p3), %s2409_s5, 256, %s2411_s11, [#allocation4], %s3097_s10, %s3097_s10, %s3094_s25  }
 0x868   : > { %3055 = dma.done.wait (%p2737_p3), [#allocation4], 256  }
 0x869   : > { %3057 = vsyncadd (%p2737_p3), [#allocation4], 4294967040 }
 0x86a PF: > { %s3946_s7 = sld [smem:[#allocation16_spill]]  ;;  %s3950_s25 = smov %s3064_s26 }
 0x86b   : > { %s3947_s22 = sld [smem:[#allocation15_spill]]  ;;  %s3952_s28 = smov %s3076_s29 }
 0x86c   : > { %s3948_s27 = sld [smem:[#allocation18_spill]] }
 0x86d   : > { %s3949_s12 = sld [smem:[#allocation17_spill]] }
 0x870   : > { %s31_s30 = sadd.s32 1, %s3946_s7  }
 0x871   : > { %p28_p4 = scmp.ge.s32.totalorder %s31_s30, 4   ;;  %s3951_s26 = smov %s3947_s22 }
 0x873   : > { %s3953_s29 = smov %s3949_s12  ;;  %30 = sbr.rel (!%p28_p4) target bundleno = 21 (0x15), region = 171 }
 0x878   :  { %2427 = vsyncpa [#allocation3], 1 }
 0x879   :  { %2429 = vsyncpa [#allocation3 + $0x1], 1 }
 0x87a   :  { %2430 = vsyncpa [#allocation6], 1 }
 0x87b   :  { %2432 = vsyncpa [#allocation6 + $0x1], 1 }
 0x87c   :  { %2433 = vsyncpa [#allocation9], 1 }
 0x87d   :  { %2435 = vsyncpa [#allocation9 + $0x1], 1 }
 0x87e   :  { %2436 = vsyncpa [#allocation4], 1 }
 0x87f   :  { %2438 = vsyncpa [#allocation4 + $0x1], 1 }

</bundles_post_ra>
